<compile_context>
chip_gen: v5e
topology: v5e:2x2
jax: 0.10.0
libtpu: 0.0.40
codegen_flags: <defaults>
</compile_context>

<pallas_src>
import functools

import jax
import jax.numpy as jnp
from jax import lax
from jax.experimental import pallas as pl
from jax.experimental.pallas import tpu as pltpu

# Pin f32 matmuls to full precision everywhere (kernel trace AND reference);
# the TPU default lowers f32 matmuls to bf16 passes, which alone produces
# ~1e-3 absolute mismatches at these magnitudes.
jax.config.update("jax_default_matmul_precision", "highest")


def encoder_layer_kernel(x_ref, wqkv_ref, bu_ref, g1_ref, be1_ref,
                         wff_ref, bff_ref, g2_ref, be2_ref, o_ref,
                         *, heads, d_model):
    D = d_model
    HD = heads * D

    x = x_ref[...]                                                  # (S, D)
    S = x.shape[0]

    # Fused QKV projection: single (S, D) x (D, 3*HD) matmul. The V block of
    # wqkv already has the unifyheads projection folded in (see fuse_params).
    qkv = jnp.dot(x, wqkv_ref[...], preferred_element_type=jnp.float32)  # (S, 3*HD)

    # Per-head attention. heads is small (4) so a static Python loop is fine;
    # at real head counts this would become lax.fori_loop(unroll=True).
    # NOTE: the 32-wide head slices are lane-unaligned; at real sizes keep
    # d_model a multiple of 128 so each head's operands are lane-tile aligned.
    attn = jnp.zeros((S, D), jnp.float32)
    for h in range(heads):
        qh = qkv[:, h * D:(h + 1) * D]
        kh = qkv[:, HD + h * D:HD + (h + 1) * D]
        vh = qkv[:, 2 * HD + h * D:2 * HD + (h + 1) * D]  # Wu-folded V'_h
        # Scores contract on the last dim of both operands (no explicit kh.T).
        # No 1/sqrt(d) scaling on purpose -- matches the PyTorch module.
        s = lax.dot_general(qh, kh, (((1,), (1,)), ((), ())),
                            preferred_element_type=jnp.float32)     # (S, S)
        s = s - jnp.max(s, axis=-1, keepdims=True)                  # stabilization
        e = jnp.exp(s)
        p = e / jnp.sum(e, axis=-1, keepdims=True)                  # exact division
        attn = attn + jnp.dot(p, vh, preferred_element_type=jnp.float32)

    attn_out = attn + bu_ref[...]
    # TODO(synk): dropout_1 / dropout_2 treated as identity (eval-mode dropout).

    def layer_norm(z, gamma, beta):
        mu = jnp.mean(z, axis=-1, keepdims=True)
        var = jnp.mean((z - mu) ** 2, axis=-1, keepdims=True)
        return (z - mu) * lax.rsqrt(var + 1e-5) * gamma + beta

    x1 = layer_norm(x + attn_out, g1_ref[...], be1_ref[...])        # (S, D)

    ff = jnp.dot(x1, wff_ref[...], preferred_element_type=jnp.float32) + bff_ref[...]
    ff = jnp.where(ff > 0, ff, jnp.exp(jnp.minimum(ff, 0.0)) - 1.0)  # ELU(alpha=1)

    o_ref[...] = layer_norm(x1 + ff, g2_ref[...], be2_ref[...])


def fuse_params(params, *, heads, d_model):
    """One-time weight fusion (call once, outside the per-forward path):
       * fold unifyheads Wu into the V projection:  wv'_h = wv_h @ wu_h
       * concatenate [Wq | Wk | Wv'] into a single (D, 3*HD) matrix."""
    wq, wk, wv, wu, bu, g1, be1, wff, bff, g2, be2 = params
    D = d_model
    HD = heads * D
    wv3 = wv.reshape(D, heads, D)            # (D_in, h, d_head)
    wu3 = wu.reshape(heads, D, D)            # (h, d_head, D_out)
    wvp = jnp.einsum("ihd,hdo->iho", wv3, wu3,
                     precision="highest").reshape(D, HD)
    wqkv = jnp.concatenate([wq, wk, wvp], axis=1)   # (D, 3*HD)
    return (wqkv, bu, g1, be1, wff, bff, g2, be2)


def encoder_layer(x, fused_params, *, heads, d_model, dff):
    wqkv, bu, g1, be1, wff, bff, g2, be2 = fused_params
    B, S, D = x.shape
    assert D == d_model and dff == d_model, "residual add requires dff == d_model"
    assert S % 8 == 0, "seq must be a multiple of 8 (sublane tile)"
    HD = heads * d_model

    kern = functools.partial(encoder_layer_kernel, heads=heads, d_model=d_model)

    def const_spec(shape):
        # Constant block index -> stays resident in VMEM across grid steps.
        return pl.BlockSpec(shape, lambda b: (0,) * len(shape))

    x2 = x.reshape(B * S, D)

    in_specs = [
        pl.BlockSpec((S, D), lambda b: (b, 0)),  # this program's batch rows
        const_spec((D, 3 * HD)),   # Wq|Wk|Wv' fused (Wu folded into V)
        const_spec((1, D)),        # b_unify
        const_spec((1, D)),        # LN1 gamma
        const_spec((1, D)),        # LN1 beta
        const_spec((D, dff)),      # W_ff
        const_spec((1, dff)),      # b_ff
        const_spec((1, D)),        # LN2 gamma
        const_spec((1, D)),        # LN2 beta
    ]
    out_specs = pl.BlockSpec((S, D), lambda b: (b, 0))

    # Batch axis on the grid (independent programs). At real sizes this would
    # be a row-tiled pipelined grid; on v7x it would be marked CORE_PARALLEL to
    # split across the two TensorCores, with vmem_limit_bytes set for 64 MiB.
    out2 = pl.pallas_call(
        kern,
        grid=(B,),
        in_specs=in_specs,
        out_specs=out_specs,
        out_shape=jax.ShapeDtypeStruct((B * S, D), jnp.float32),
        compiler_params=pltpu.CompilerParams(dimension_semantics=("arbitrary",)),
    )(x2, wqkv, bu, g1, be1, wff, bff, g2, be2)
    return out2.reshape(B, S, D)


def reference_jax(x, params, *, heads, d_model):
    """Pure-JAX reference mirroring the PyTorch forward, for verification."""
    wq, wk, wv, wu, bu, g1, be1, wff, bff, g2, be2 = params
    B, S, D = x.shape
    q = (x @ wq).reshape(B, S, heads, d_model)
    k = (x @ wk).reshape(B, S, heads, d_model)
    v = (x @ wv).reshape(B, S, heads, d_model)
    scores = jnp.einsum("bqhd,bkhd->bhqk", q, k, precision="highest")
    p = jax.nn.softmax(scores, axis=-1)
    o = jnp.einsum("bhqk,bkhd->bqhd", p, v,
                   precision="highest").reshape(B, S, heads * d_model)
    attn_out = o @ wu + bu[0]

    def ln(z, g, b):
        mu = jnp.mean(z, axis=-1, keepdims=True)
        var = jnp.mean((z - mu) ** 2, axis=-1, keepdims=True)
        return (z - mu) / jnp.sqrt(var + 1e-5) * g[0] + b[0]

    x1 = ln(x + attn_out, g1, be1)
    ff = x1 @ wff + bff[0]
    ff = jnp.where(ff > 0, ff, jnp.exp(jnp.minimum(ff, 0.0)) - 1.0)
    return ln(x1 + ff, g2, be2)


if __name__ == "__main__":
    heads, d_model = 4, 32
    dff = d_model          # residual add in the PyTorch module requires this
    B, S = 2, 8

    key = jax.random.PRNGKey(0)
    ks = jax.random.split(key, 8)
    scale = 0.1
    wq = scale * jax.random.normal(ks[0], (d_model, heads * d_model), jnp.float32)
    wk = scale * jax.random.normal(ks[1], (d_model, heads * d_model), jnp.float32)
    wv = scale * jax.random.normal(ks[2], (d_model, heads * d_model), jnp.float32)
    wu = scale * jax.random.normal(ks[3], (heads * d_model, d_model), jnp.float32)
    bu = scale * jax.random.normal(ks[4], (1, d_model), jnp.float32)
    g1 = jnp.ones((1, d_model), jnp.float32)
    be1 = jnp.zeros((1, d_model), jnp.float32)
    wff = scale * jax.random.normal(ks[5], (d_model, dff), jnp.float32)
    bff = scale * jax.random.normal(ks[6], (1, dff), jnp.float32)
    g2 = jnp.ones((1, d_model), jnp.float32)
    be2 = jnp.zeros((1, d_model), jnp.float32)
    params = (wq, wk, wv, wu, bu, g1, be1, wff, bff, g2, be2)

    x = jax.random.normal(ks[7], (B, S, d_model), jnp.float32)

    # One-time weight fusion (outside the per-call forward path).
    fused = jax.tree_util.tree_map(jax.block_until_ready,
                                   fuse_params(params, heads=heads, d_model=d_model))

    out = encoder_layer(x, fused, heads=heads, d_model=d_model, dff=dff)
    out = jax.block_until_ready(out)

    ref = reference_jax(x, params, heads=heads, d_model=d_model)
    assert out.shape == (B, S, d_model)
    # Exact-division softmax + true-f32 matmuls on both sides: expected error is
    # O(1e-5); 5e-4 leaves margin for cross-backend reassociation differences.
    err = jnp.max(jnp.abs(out - ref))
    assert err < 5e-4, f"mismatch vs pure-JAX reference: {err}"

    print("KERNEL_OK")
</pallas_src>

<mosaic_0001>
module attributes {stable_mosaic.version = 11 : i64} {
  func.func @encoder_layer_kernel(%arg0: i32, %arg1: memref<8x32xf32, #tpu.memory_space<vmem>>, %arg2: memref<32x384xf32, #tpu.memory_space<vmem>>, %arg3: memref<1x32xf32, #tpu.memory_space<vmem>>, %arg4: memref<1x32xf32, #tpu.memory_space<vmem>>, %arg5: memref<1x32xf32, #tpu.memory_space<vmem>>, %arg6: memref<32x32xf32, #tpu.memory_space<vmem>>, %arg7: memref<1x32xf32, #tpu.memory_space<vmem>>, %arg8: memref<1x32xf32, #tpu.memory_space<vmem>>, %arg9: memref<1x32xf32, #tpu.memory_space<vmem>>, %arg10: memref<8x32xf32, #tpu.memory_space<vmem>>) attributes {dimension_semantics = [#tpu.dimension_semantics<arbitrary>], iteration_bounds = array<i64: 2>, scalar_prefetch = 0 : i64, scratch_operands = 0 : i64, tpu.core_type = #tpu.core_type<tc>, window_params = [{transform_indices = @transform_0, window_bounds = array<i64: 8, 32>}, {pipeline_mode = #tpu.pipeline_mode<synchronous>, transform_indices = @transform_1, window_bounds = array<i64: 32, 384>}, {pipeline_mode = #tpu.pipeline_mode<synchronous>, transform_indices = @transform_2, window_bounds = array<i64: 1, 32>}, {pipeline_mode = #tpu.pipeline_mode<synchronous>, transform_indices = @transform_3, window_bounds = array<i64: 1, 32>}, {pipeline_mode = #tpu.pipeline_mode<synchronous>, transform_indices = @transform_4, window_bounds = array<i64: 1, 32>}, {pipeline_mode = #tpu.pipeline_mode<synchronous>, transform_indices = @transform_5, window_bounds = array<i64: 32, 32>}, {pipeline_mode = #tpu.pipeline_mode<synchronous>, transform_indices = @transform_6, window_bounds = array<i64: 1, 32>}, {pipeline_mode = #tpu.pipeline_mode<synchronous>, transform_indices = @transform_7, window_bounds = array<i64: 1, 32>}, {pipeline_mode = #tpu.pipeline_mode<synchronous>, transform_indices = @transform_8, window_bounds = array<i64: 1, 32>}, {transform_indices = @transform_9, window_bounds = array<i64: 8, 32>}]} {
    %c0 = arith.constant 0 : index
    %c0_0 = arith.constant 0 : index
    %0 = vector.load %arg1[%c0, %c0_0] : memref<8x32xf32, #tpu.memory_space<vmem>>, vector<8x32xf32>
    %c0_1 = arith.constant 0 : index
    %c0_2 = arith.constant 0 : index
    %1 = vector.load %arg2[%c0_1, %c0_2] : memref<32x384xf32, #tpu.memory_space<vmem>>, vector<32x384xf32>
    %cst = arith.constant dense<0.000000e+00> : vector<8x384xf32>
    %2 = tpu.matmul %0, %1, %cst {dimension_numbers = #tpu.dot_dimension_numbers<[1], [0], [0], [1], [0, 0, 1, 1], [], []>, precision = #tpu.contract_precision<fp32>} : vector<8x32xf32>, vector<32x384xf32>, vector<8x384xf32> -> vector<8x384xf32>
    %cst_3 = arith.constant 0.000000e+00 : f32
    %3 = vector.broadcast %cst_3 : f32 to vector<8x32xf32>
    %4 = vector.extract_strided_slice %2 {offsets = [0, 0], sizes = [8, 32], strides = [1, 1]} : vector<8x384xf32> to vector<8x32xf32>
    %5 = vector.extract_strided_slice %2 {offsets = [0, 128], sizes = [8, 32], strides = [1, 1]} : vector<8x384xf32> to vector<8x32xf32>
    %6 = vector.extract_strided_slice %2 {offsets = [0, 256], sizes = [8, 32], strides = [1, 1]} : vector<8x384xf32> to vector<8x32xf32>
    %cst_4 = arith.constant dense<0.000000e+00> : vector<8x8xf32>
    %7 = tpu.matmul %4, %5, %cst_4 {dimension_numbers = #tpu.dot_dimension_numbers<[1], [1], [0], [0], [0, 0, 1, 0], [], []>, precision = #tpu.contract_precision<fp32>} : vector<8x32xf32>, vector<8x32xf32>, vector<8x8xf32> -> vector<8x8xf32>
    %cst_5 = arith.constant dense<0xFF800000> : vector<8xf32>
    %8 = vector.multi_reduction <maximumf>, %7, %cst_5 [1] : vector<8x8xf32> to vector<8xf32>
    %9 = vector.shape_cast %8 : vector<8xf32> to vector<8x1xf32>
    %10 = vector.broadcast %9 : vector<8x1xf32> to vector<8x8xf32>
    %11 = arith.subf %7, %10 : vector<8x8xf32>
    %12 = math.exp %11 : vector<8x8xf32>
    %cst_6 = arith.constant dense<0.000000e+00> : vector<8xf32>
    %13 = vector.multi_reduction <add>, %12, %cst_6 [1] : vector<8x8xf32> to vector<8xf32>
    %14 = vector.shape_cast %13 : vector<8xf32> to vector<8x1xf32>
    %15 = vector.broadcast %14 : vector<8x1xf32> to vector<8x8xf32>
    %16 = arith.divf %12, %15 : vector<8x8xf32>
    %cst_7 = arith.constant dense<0.000000e+00> : vector<8x32xf32>
    %17 = tpu.matmul %16, %6, %cst_7 {dimension_numbers = #tpu.dot_dimension_numbers<[1], [0], [0], [1], [0, 0, 1, 1], [], []>, precision = #tpu.contract_precision<fp32>} : vector<8x8xf32>, vector<8x32xf32>, vector<8x32xf32> -> vector<8x32xf32>
    %18 = arith.addf %3, %17 : vector<8x32xf32>
    %19 = vector.extract_strided_slice %2 {offsets = [0, 32], sizes = [8, 32], strides = [1, 1]} : vector<8x384xf32> to vector<8x32xf32>
    %20 = vector.extract_strided_slice %2 {offsets = [0, 160], sizes = [8, 32], strides = [1, 1]} : vector<8x384xf32> to vector<8x32xf32>
    %21 = vector.extract_strided_slice %2 {offsets = [0, 288], sizes = [8, 32], strides = [1, 1]} : vector<8x384xf32> to vector<8x32xf32>
    %cst_8 = arith.constant dense<0.000000e+00> : vector<8x8xf32>
    %22 = tpu.matmul %19, %20, %cst_8 {dimension_numbers = #tpu.dot_dimension_numbers<[1], [1], [0], [0], [0, 0, 1, 0], [], []>, precision = #tpu.contract_precision<fp32>} : vector<8x32xf32>, vector<8x32xf32>, vector<8x8xf32> -> vector<8x8xf32>
    %cst_9 = arith.constant dense<0xFF800000> : vector<8xf32>
    %23 = vector.multi_reduction <maximumf>, %22, %cst_9 [1] : vector<8x8xf32> to vector<8xf32>
    %24 = vector.shape_cast %23 : vector<8xf32> to vector<8x1xf32>
    %25 = vector.broadcast %24 : vector<8x1xf32> to vector<8x8xf32>
    %26 = arith.subf %22, %25 : vector<8x8xf32>
    %27 = math.exp %26 : vector<8x8xf32>
    %cst_10 = arith.constant dense<0.000000e+00> : vector<8xf32>
    %28 = vector.multi_reduction <add>, %27, %cst_10 [1] : vector<8x8xf32> to vector<8xf32>
    %29 = vector.shape_cast %28 : vector<8xf32> to vector<8x1xf32>
    %30 = vector.broadcast %29 : vector<8x1xf32> to vector<8x8xf32>
    %31 = arith.divf %27, %30 : vector<8x8xf32>
    %cst_11 = arith.constant dense<0.000000e+00> : vector<8x32xf32>
    %32 = tpu.matmul %31, %21, %cst_11 {dimension_numbers = #tpu.dot_dimension_numbers<[1], [0], [0], [1], [0, 0, 1, 1], [], []>, precision = #tpu.contract_precision<fp32>} : vector<8x8xf32>, vector<8x32xf32>, vector<8x32xf32> -> vector<8x32xf32>
    %33 = arith.addf %18, %32 : vector<8x32xf32>
    %34 = vector.extract_strided_slice %2 {offsets = [0, 64], sizes = [8, 32], strides = [1, 1]} : vector<8x384xf32> to vector<8x32xf32>
    %35 = vector.extract_strided_slice %2 {offsets = [0, 192], sizes = [8, 32], strides = [1, 1]} : vector<8x384xf32> to vector<8x32xf32>
    %36 = vector.extract_strided_slice %2 {offsets = [0, 320], sizes = [8, 32], strides = [1, 1]} : vector<8x384xf32> to vector<8x32xf32>
    %cst_12 = arith.constant dense<0.000000e+00> : vector<8x8xf32>
    %37 = tpu.matmul %34, %35, %cst_12 {dimension_numbers = #tpu.dot_dimension_numbers<[1], [1], [0], [0], [0, 0, 1, 0], [], []>, precision = #tpu.contract_precision<fp32>} : vector<8x32xf32>, vector<8x32xf32>, vector<8x8xf32> -> vector<8x8xf32>
    %cst_13 = arith.constant dense<0xFF800000> : vector<8xf32>
    %38 = vector.multi_reduction <maximumf>, %37, %cst_13 [1] : vector<8x8xf32> to vector<8xf32>
    %39 = vector.shape_cast %38 : vector<8xf32> to vector<8x1xf32>
    %40 = vector.broadcast %39 : vector<8x1xf32> to vector<8x8xf32>
    %41 = arith.subf %37, %40 : vector<8x8xf32>
    %42 = math.exp %41 : vector<8x8xf32>
    %cst_14 = arith.constant dense<0.000000e+00> : vector<8xf32>
    %43 = vector.multi_reduction <add>, %42, %cst_14 [1] : vector<8x8xf32> to vector<8xf32>
    %44 = vector.shape_cast %43 : vector<8xf32> to vector<8x1xf32>
    %45 = vector.broadcast %44 : vector<8x1xf32> to vector<8x8xf32>
    %46 = arith.divf %42, %45 : vector<8x8xf32>
    %cst_15 = arith.constant dense<0.000000e+00> : vector<8x32xf32>
    %47 = tpu.matmul %46, %36, %cst_15 {dimension_numbers = #tpu.dot_dimension_numbers<[1], [0], [0], [1], [0, 0, 1, 1], [], []>, precision = #tpu.contract_precision<fp32>} : vector<8x8xf32>, vector<8x32xf32>, vector<8x32xf32> -> vector<8x32xf32>
    %48 = arith.addf %33, %47 : vector<8x32xf32>
    %49 = vector.extract_strided_slice %2 {offsets = [0, 96], sizes = [8, 32], strides = [1, 1]} : vector<8x384xf32> to vector<8x32xf32>
    %50 = vector.extract_strided_slice %2 {offsets = [0, 224], sizes = [8, 32], strides = [1, 1]} : vector<8x384xf32> to vector<8x32xf32>
    %51 = vector.extract_strided_slice %2 {offsets = [0, 352], sizes = [8, 32], strides = [1, 1]} : vector<8x384xf32> to vector<8x32xf32>
    %cst_16 = arith.constant dense<0.000000e+00> : vector<8x8xf32>
    %52 = tpu.matmul %49, %50, %cst_16 {dimension_numbers = #tpu.dot_dimension_numbers<[1], [1], [0], [0], [0, 0, 1, 0], [], []>, precision = #tpu.contract_precision<fp32>} : vector<8x32xf32>, vector<8x32xf32>, vector<8x8xf32> -> vector<8x8xf32>
    %cst_17 = arith.constant dense<0xFF800000> : vector<8xf32>
    %53 = vector.multi_reduction <maximumf>, %52, %cst_17 [1] : vector<8x8xf32> to vector<8xf32>
    %54 = vector.shape_cast %53 : vector<8xf32> to vector<8x1xf32>
    %55 = vector.broadcast %54 : vector<8x1xf32> to vector<8x8xf32>
    %56 = arith.subf %52, %55 : vector<8x8xf32>
    %57 = math.exp %56 : vector<8x8xf32>
    %cst_18 = arith.constant dense<0.000000e+00> : vector<8xf32>
    %58 = vector.multi_reduction <add>, %57, %cst_18 [1] : vector<8x8xf32> to vector<8xf32>
    %59 = vector.shape_cast %58 : vector<8xf32> to vector<8x1xf32>
    %60 = vector.broadcast %59 : vector<8x1xf32> to vector<8x8xf32>
    %61 = arith.divf %57, %60 : vector<8x8xf32>
    %cst_19 = arith.constant dense<0.000000e+00> : vector<8x32xf32>
    %62 = tpu.matmul %61, %51, %cst_19 {dimension_numbers = #tpu.dot_dimension_numbers<[1], [0], [0], [1], [0, 0, 1, 1], [], []>, precision = #tpu.contract_precision<fp32>} : vector<8x8xf32>, vector<8x32xf32>, vector<8x32xf32> -> vector<8x32xf32>
    %63 = arith.addf %48, %62 : vector<8x32xf32>
    %c0_20 = arith.constant 0 : index
    %c0_21 = arith.constant 0 : index
    %64 = vector.load %arg3[%c0_20, %c0_21] : memref<1x32xf32, #tpu.memory_space<vmem>>, vector<1x32xf32>
    %65 = vector.broadcast %64 : vector<1x32xf32> to vector<8x32xf32>
    %66 = arith.addf %63, %65 : vector<8x32xf32>
    %67 = arith.addf %0, %66 : vector<8x32xf32>
    %c0_22 = arith.constant 0 : index
    %c0_23 = arith.constant 0 : index
    %68 = vector.load %arg4[%c0_22, %c0_23] : memref<1x32xf32, #tpu.memory_space<vmem>>, vector<1x32xf32>
    %c0_24 = arith.constant 0 : index
    %c0_25 = arith.constant 0 : index
    %69 = vector.load %arg5[%c0_24, %c0_25] : memref<1x32xf32, #tpu.memory_space<vmem>>, vector<1x32xf32>
    %cst_26 = arith.constant dense<0.000000e+00> : vector<8xf32>
    %70 = vector.multi_reduction <add>, %67, %cst_26 [1] : vector<8x32xf32> to vector<8xf32>
    %71 = vector.shape_cast %70 : vector<8xf32> to vector<8x1xf32>
    %cst_27 = arith.constant 3.200000e+01 : f32
    %72 = vector.broadcast %cst_27 : f32 to vector<8x1xf32>
    %73 = arith.divf %71, %72 : vector<8x1xf32>
    %74 = vector.broadcast %73 : vector<8x1xf32> to vector<8x32xf32>
    %75 = arith.subf %67, %74 : vector<8x32xf32>
    %76 = arith.mulf %75, %75 : vector<8x32xf32>
    %cst_28 = arith.constant dense<0.000000e+00> : vector<8xf32>
    %77 = vector.multi_reduction <add>, %76, %cst_28 [1] : vector<8x32xf32> to vector<8xf32>
    %78 = vector.shape_cast %77 : vector<8xf32> to vector<8x1xf32>
    %cst_29 = arith.constant 3.200000e+01 : f32
    %79 = vector.broadcast %cst_29 : f32 to vector<8x1xf32>
    %80 = arith.divf %78, %79 : vector<8x1xf32>
    %81 = vector.broadcast %73 : vector<8x1xf32> to vector<8x32xf32>
    %82 = arith.subf %67, %81 : vector<8x32xf32>
    %cst_30 = arith.constant 9.99999974E-6 : f32
    %83 = vector.broadcast %cst_30 : f32 to vector<8x1xf32>
    %84 = arith.addf %80, %83 : vector<8x1xf32>
    %85 = math.rsqrt %84 : vector<8x1xf32>
    %86 = vector.broadcast %85 : vector<8x1xf32> to vector<8x32xf32>
    %87 = arith.mulf %82, %86 : vector<8x32xf32>
    %88 = vector.broadcast %68 : vector<1x32xf32> to vector<8x32xf32>
    %89 = arith.mulf %87, %88 : vector<8x32xf32>
    %90 = vector.broadcast %69 : vector<1x32xf32> to vector<8x32xf32>
    %91 = arith.addf %89, %90 : vector<8x32xf32>
    %c0_31 = arith.constant 0 : index
    %c0_32 = arith.constant 0 : index
    %92 = vector.load %arg6[%c0_31, %c0_32] : memref<32x32xf32, #tpu.memory_space<vmem>>, vector<32x32xf32>
    %cst_33 = arith.constant dense<0.000000e+00> : vector<8x32xf32>
    %93 = tpu.matmul %91, %92, %cst_33 {dimension_numbers = #tpu.dot_dimension_numbers<[1], [0], [0], [1], [0, 0, 1, 1], [], []>, precision = #tpu.contract_precision<fp32>} : vector<8x32xf32>, vector<32x32xf32>, vector<8x32xf32> -> vector<8x32xf32>
    %c0_34 = arith.constant 0 : index
    %c0_35 = arith.constant 0 : index
    %94 = vector.load %arg7[%c0_34, %c0_35] : memref<1x32xf32, #tpu.memory_space<vmem>>, vector<1x32xf32>
    %95 = vector.broadcast %94 : vector<1x32xf32> to vector<8x32xf32>
    %96 = arith.addf %93, %95 : vector<8x32xf32>
    %cst_36 = arith.constant 0.000000e+00 : f32
    %97 = vector.broadcast %cst_36 : f32 to vector<8x32xf32>
    %98 = arith.cmpf ogt, %96, %97 : vector<8x32xf32>
    %cst_37 = arith.constant 0.000000e+00 : f32
    %99 = vector.broadcast %cst_37 : f32 to vector<8x32xf32>
    %100 = arith.minimumf %96, %99 : vector<8x32xf32>
    %101 = math.exp %100 : vector<8x32xf32>
    %cst_38 = arith.constant 1.000000e+00 : f32
    %102 = vector.broadcast %cst_38 : f32 to vector<8x32xf32>
    %103 = arith.subf %101, %102 : vector<8x32xf32>
    %104 = arith.select %98, %96, %103 : vector<8x32xi1>, vector<8x32xf32>
    %105 = arith.addf %91, %104 : vector<8x32xf32>
    %c0_39 = arith.constant 0 : index
    %c0_40 = arith.constant 0 : index
    %106 = vector.load %arg8[%c0_39, %c0_40] : memref<1x32xf32, #tpu.memory_space<vmem>>, vector<1x32xf32>
    %c0_41 = arith.constant 0 : index
    %c0_42 = arith.constant 0 : index
    %107 = vector.load %arg9[%c0_41, %c0_42] : memref<1x32xf32, #tpu.memory_space<vmem>>, vector<1x32xf32>
    %cst_43 = arith.constant dense<0.000000e+00> : vector<8xf32>
    %108 = vector.multi_reduction <add>, %105, %cst_43 [1] : vector<8x32xf32> to vector<8xf32>
    %109 = vector.shape_cast %108 : vector<8xf32> to vector<8x1xf32>
    %cst_44 = arith.constant 3.200000e+01 : f32
    %110 = vector.broadcast %cst_44 : f32 to vector<8x1xf32>
    %111 = arith.divf %109, %110 : vector<8x1xf32>
    %112 = vector.broadcast %111 : vector<8x1xf32> to vector<8x32xf32>
    %113 = arith.subf %105, %112 : vector<8x32xf32>
    %114 = arith.mulf %113, %113 : vector<8x32xf32>
    %cst_45 = arith.constant dense<0.000000e+00> : vector<8xf32>
    %115 = vector.multi_reduction <add>, %114, %cst_45 [1] : vector<8x32xf32> to vector<8xf32>
    %116 = vector.shape_cast %115 : vector<8xf32> to vector<8x1xf32>
    %cst_46 = arith.constant 3.200000e+01 : f32
    %117 = vector.broadcast %cst_46 : f32 to vector<8x1xf32>
    %118 = arith.divf %116, %117 : vector<8x1xf32>
    %119 = vector.broadcast %111 : vector<8x1xf32> to vector<8x32xf32>
    %120 = arith.subf %105, %119 : vector<8x32xf32>
    %cst_47 = arith.constant 9.99999974E-6 : f32
    %121 = vector.broadcast %cst_47 : f32 to vector<8x1xf32>
    %122 = arith.addf %118, %121 : vector<8x1xf32>
    %123 = math.rsqrt %122 : vector<8x1xf32>
    %124 = vector.broadcast %123 : vector<8x1xf32> to vector<8x32xf32>
    %125 = arith.mulf %120, %124 : vector<8x32xf32>
    %126 = vector.broadcast %106 : vector<1x32xf32> to vector<8x32xf32>
    %127 = arith.mulf %125, %126 : vector<8x32xf32>
    %128 = vector.broadcast %107 : vector<1x32xf32> to vector<8x32xf32>
    %129 = arith.addf %127, %128 : vector<8x32xf32>
    %c0_48 = arith.constant 0 : index
    %c0_49 = arith.constant 0 : index
    %130 = vector.load %arg10[%c0_48, %c0_49] : memref<8x32xf32, #tpu.memory_space<vmem>>, vector<8x32xf32>
    tpu.vector_store %arg10[%c0_48, %c0_49], %129 {strides = array<i32>} : memref<8x32xf32, #tpu.memory_space<vmem>>, vector<8x32xf32>,
    return
  }
  func.func @transform_0(%arg0: i32) -> (i32, i32) {
    %c0_i32 = arith.constant 0 : i32
    %c0_i32_0 = arith.constant 0 : i32
    return %arg0, %c0_i32 : i32, i32
  }
  func.func @transform_1(%arg0: i32) -> (i32, i32) {
    %c0_i32 = arith.constant 0 : i32
    %c0_i32_0 = arith.constant 0 : i32
    %c0_i32_1 = arith.constant 0 : i32
    return %c0_i32, %c0_i32_0 : i32, i32
  }
  func.func @transform_2(%arg0: i32) -> (i32, i32) {
    %c0_i32 = arith.constant 0 : i32
    %c0_i32_0 = arith.constant 0 : i32
    %c0_i32_1 = arith.constant 0 : i32
    return %c0_i32, %c0_i32_0 : i32, i32
  }
  func.func @transform_3(%arg0: i32) -> (i32, i32) {
    %c0_i32 = arith.constant 0 : i32
    %c0_i32_0 = arith.constant 0 : i32
    %c0_i32_1 = arith.constant 0 : i32
    return %c0_i32, %c0_i32_0 : i32, i32
  }
  func.func @transform_4(%arg0: i32) -> (i32, i32) {
    %c0_i32 = arith.constant 0 : i32
    %c0_i32_0 = arith.constant 0 : i32
    %c0_i32_1 = arith.constant 0 : i32
    return %c0_i32, %c0_i32_0 : i32, i32
  }
  func.func @transform_5(%arg0: i32) -> (i32, i32) {
    %c0_i32 = arith.constant 0 : i32
    %c0_i32_0 = arith.constant 0 : i32
    %c0_i32_1 = arith.constant 0 : i32
    return %c0_i32, %c0_i32_0 : i32, i32
  }
  func.func @transform_6(%arg0: i32) -> (i32, i32) {
    %c0_i32 = arith.constant 0 : i32
    %c0_i32_0 = arith.constant 0 : i32
    %c0_i32_1 = arith.constant 0 : i32
    return %c0_i32, %c0_i32_0 : i32, i32
  }
  func.func @transform_7(%arg0: i32) -> (i32, i32) {
    %c0_i32 = arith.constant 0 : i32
    %c0_i32_0 = arith.constant 0 : i32
    %c0_i32_1 = arith.constant 0 : i32
    return %c0_i32, %c0_i32_0 : i32, i32
  }
  func.func @transform_8(%arg0: i32) -> (i32, i32) {
    %c0_i32 = arith.constant 0 : i32
    %c0_i32_0 = arith.constant 0 : i32
    %c0_i32_1 = arith.constant 0 : i32
    return %c0_i32, %c0_i32_0 : i32, i32
  }
  func.func @transform_9(%arg0: i32) -> (i32, i32) {
    %c0_i32 = arith.constant 0 : i32
    %c0_i32_0 = arith.constant 0 : i32
    return %arg0, %c0_i32 : i32, i32
  }
}

</mosaic_0001>

<bundles_post_ra>
// kernel: tpu_custom_call.1
= control target key start
LH: loop header
LB: loop body
LE: loop exit
PB: predicated region body
PF: predicated region fallthrough
CT: control target
= control target key end

     0   :  { %s3378_s0 = inlined_call_operand.hbm [shape: f32[16,32], index: 0, kind: input, shape index: {}]   ;;  %s3379_s1 = inlined_call_operand.hbm [shape: f32[32,384], index: 1, kind: input, shape index: {}]   ;;  %s3380_s2 = inlined_call_operand.vmem [shape: f32[1,32], index: 2, kind: input, shape index: {}]   ;;  %s3381_s3 = inlined_call_operand.vmem [shape: f32[1,32], index: 3, kind: input, shape index: {}]   ;;  %s3382_s4 = inlined_call_operand.vmem [shape: f32[1,32], index: 4, kind: input, shape index: {}]   ;;  %s3383_s5 = inlined_call_operand.hbm [shape: f32[32,32], index: 5, kind: input, shape index: {}]   ;;  %s3384_s6 = inlined_call_operand.vmem [shape: f32[1,32], index: 6, kind: input, shape index: {}]   ;;  %s3385_s7 = inlined_call_operand.vmem [shape: f32[1,32], index: 7, kind: input, shape index: {}]   ;;  %s3386_s8 = inlined_call_operand.vmem [shape: f32[1,32], index: 8, kind: input, shape index: {}]   ;;  %s3387_s9 = inlined_call_operand.hbm [shape: f32[16,32], index: 9, kind: output, shape index: {}]  }
   0x1   :  { %3389 = sst [smem:[#allocation14_spill]] %s3379_s1 }
   0x2   :  { %3390 = sst [smem:[#allocation15_spill]] %s3383_s5 }
   0x3   :  { %14 = vsyncpa [#allocation3], 0 }
   0x4   :  { %16 = vsyncpa [#allocation3 + $0x1], 0 }
   0x5   :  { %17 = vsyncpa [#allocation6], 0 }
   0x6   :  { %18 = vsyncpa [#allocation4], 0 }
   0x7   :  { %20 = vsyncpa [#allocation4 + $0x1], 0  ;;  %s3005_s30 = smov 0   ;;  %s3007_s10 = smov 0  }
   0x8   :  { %s3009_s11 = smov 0   ;;  %s3011_s12 = smov 0  }
   0x9 LB: > { %3391 = sst [smem:[#allocation12_spill]] %s2939_s11  ;;  %s3029_s16 = sadd.s32 4294967295, %s2943_s12   ;;  %s2943_s12 = sphi %s3011_s12, %s3406_s12   ;;  %s2939_s11 = sphi %s3009_s11, %s3403_s11   ;;  %s2935_s10 = sphi %s3007_s10, %s3405_s10   ;;  %s2931_s30 = sphi %s3005_s30, %s3404_s30  }
   0xa   : > { %s3392_s1 = sld [smem:[#allocation14_spill]]  ;;  %p2661_p0 = scmp.ge.s32.totalorder %s2943_s12, 1 }
   0xb   : > { %p47_p1 = scmp.eq.s32.totalorder %s3029_s16, 0  ;;  %p251_p2 = scmp.lt.s32.totalorder %s2943_s12, 3 }
   0xc   : > { %s2945_s18 = smov [#allocation5]   ;;  %s3394_s5 = sld [smem:[#allocation15_spill]] }
   0xd   : > { %p3034_p3 = pnand %p2661_p0, %p251_p2  ;;  %s264_s19 = sshll.u32 %s2945_s18, 4  ;;  %s265_s19 = int_to_ptr.vmem [resolvable:$true] %s264_s19 }
   0xe   : > { %s2946_s23 = smov [#allocation7]   ;;  %s2947_s25 = smov 384  }
   0xf   : > { %p2689_p4 = pneg %p3034_p3  ;;  %s287_s24 = sshll.u32 %s2946_s23, 4  ;;  %s288_s24 = int_to_ptr.vmem [resolvable:$true] %s287_s24 }
  0x10   : > { %s262_s15 = sshll.u32 %s3392_s1, 4  ;;  %s2948_s26 = smov 24   ;;  %s263_s15 = int_to_ptr.hbm [resolvable:$true] %s262_s15 }
  0x11   : > { %p2690_p6 = pnand %p2689_p4, %p47_p1  ;;  %s2949_s27 = smov 128  }
  0x12   : > { %s285_s22 = sshll.u32 %s3394_s5, 4  ;;  %s2950_s28 = smov 8   ;;  %s286_s22 = int_to_ptr.hbm [resolvable:$true] %s285_s22 }
  0x13   : > { %2692 = dma.hbm_to_vmem [thread:$0]  (!%p2690_p6), %s263_s15, 1536, %s265_s19, [#allocation6], %s2947_s25, %s2947_s25, %s2948_s26  }
  0x14   : > { %2695 = dma.hbm_to_vmem [thread:$0]  (!%p2690_p6), %s286_s22, 512, %s288_s24, [#allocation6], %s2949_s27, %s2949_s27, %s2950_s28  }
  0x15   : > { %s2660_s29 = sadd.s32 4294967294, %s2943_s12   ;;  %s3048_s13 = sadd.s32 1, %s2943_s12  }
  0x16   : > { %s30_s14 = ssub.s32 %s2943_s12, %s3048_s13  ;;  %s33_s18 = sadd.s32 1, %s2939_s11 }
  0x17   : > { %p31_p7 = scmp.eq.s32.totalorder %s30_s14, 0  ;;  %p40_p8 = scmp.ne.s32.totalorder %s2939_s11, %s2935_s10 }
  0x18   : > { %p41_p9 = scmp.eq.s32.totalorder %s2943_s12, 0  ;;  %p46_p10 = scmp.ne.s32.totalorder %s2935_s10, %s2931_s30 }
  0x19   : > { %s3059_s20 = scalar_select %p31_p7, %s2939_s11, %s33_s18  }
  0x1a   : > { %p3061_p11 = por %p41_p9, %p40_p8  ;;  %p3067_p12 = por %p47_p1, %p46_p10 }
  0x1b   : > { %3395 = sst [smem:[#allocation13_spill]] %s3059_s20  ;;  %p238_p13 = scmp.eq.s32.totalorder %s3029_s16, 1 }
  0x1c   : > { %p244_p0 = scmp.eq.s32.totalorder %s2660_s29, 1  ;;  %p2706_p2 = scmp.lt.s32.totalorder %s2943_s12, 2 }
  0x1d   : > { %s310_s21 = sand.u32 1, %s2939_s11   ;;  %p3074_p4 = por %p238_p13, %p40_p8 }
  0x1e   : > { %p3078_p6 = por %p244_p0, %p46_p10  ;;  %s2665_s24 = sshll.u32 %s310_s21, 3 }
  0x1f   : > { %s2666_s25 = sshll.u32 %s2943_s12, 3  ;;  %s314_s14 = scalar_lea.vmem [#allocation2], %s2665_s24 }
  0x20   : > { %s318_s28 = scalar_lea.hbm %s3378_s0, %s2666_s25  ;;  %s322_s18 = sshll.u32 %s314_s14, 4  ;;  %s323_s18 = int_to_ptr.vmem [resolvable:$true] %s322_s18 }
  0x21   : > { %s320_s1 = sshll.u32 %s318_s28, 4  ;;  %p3088_p7 = pnand %p2706_p2, %p3061_p11  ;;  %s321_s1 = int_to_ptr.hbm [resolvable:$true] %s320_s1 }
  0x22   : > { %s311_s5 = scalar_lea.sflag [#allocation3], %s310_s21  ;;  %s2843_s20 = sshra.s32 %s321_s1, 4  ;;  %s2844_s20 = int_to_ptr.hbm [resolvable:$true] %s2843_s20 }
  0x23   : > { %s2845_s11 = scalar_lea.hbm %s2844_s20, 8  ;;  %p2847_p9 = pneg %p3088_p7 }
  0x24   : > { %p2846_p8 = scmp.ne.s32.totalorder %s2844_s20, %s2845_s11  ;;  %s2850_s26 = scalar_lea.hbm %s3378_s0, 16 }
  0x25   : > { %p2851_p11 = scmp.lt.s32.totalorder %s2844_s20, %s3378_s0  ;;  %p2852_p0 = scmp.lt.s32.totalorder %s2850_s26, %s2845_s11 }
  0x26   : > { %p2848_p10 = pnand %p2847_p9, %p2846_p8 }
  0x27   : > { %p2853_p2 = por %p2852_p0, %p2851_p11 }
  0x28   : > { %p2849_p13 = pneg %p2848_p10 }
  0x2a   : > { %p2854_p5 = pnand %p2853_p2, %p2849_p13 }
  0x2c   : > { %2857 = shalt.err (!%p2854_p5)
}
  0x2d   : > { %2699 = dma.hbm_to_vmem [thread:$0]  (!%p3088_p7), %s321_s1, 128, %s323_s18, %s311_s5  }
  0x2e   : > { %331 = sbr.rel (%p3034_p3) target bundleno = 2491 (0x9bb), region = 56  ;;  %s3105_s21 = sand.u32 (!%p3034_p3), 1, %s2935_s10  }
  0x2f   : > { %s2668_s28 = sshll.u32 (!%p3034_p3), %s3105_s21, 3  ;;  %s334_s14 = scalar_lea.sflag (!%p3034_p3), [#allocation3], %s3105_s21 }
  0x30   : > { %s3111_s11 = scalar_lea.vmem (!%p3034_p3), [#allocation2], %s2668_s28 }
  0x33   : > { %2918 = dma.done.wait (%p3067_p12), %s334_s14, 128  }
  0x34   : > { %2920 = vsyncadd (%p3067_p12), %s334_s14, 4294967168 }
  0x35   : > { %2922 = dma.done.wait (%p47_p1), [#allocation6], 2048  }
  0x36   : > { %2924 = vsyncadd (%p47_p1), [#allocation6], 4294965248  ;;  %vm396_vm0 = vcmask 261120   ;;  %v393_v0 = vld [vmem:[#allocation5 + $0x48] sm:$0xff]  ;;  %v390_v1 = vld [vmem:[#allocation5 + $0x30] sm:$0xff]  ;;  %s2951_s1 = smov 96  }
  0x37   : > { %v387_v2 = vld [vmem:[#allocation5 + $0x18] sm:$0xff]  ;;  %v3121_v3 = vand.u32 4294901760, %v393_v0  ;;  %v3123_v4 = vand.u32 4294901760, %v390_v1  ;;  %v384_v6 = vld [vmem:[#allocation5] sm:$0xff]  ;;  %v394_v8 = vld [vmem:[#allocation5 + $0x50] sm:$0xff]  ;;  %vm1107_vm1 = vcmask 64512  }
  0x38   : > { %v3125_v5 = vand.u32 4294901760, %v387_v2  ;;  %v383_v7 = vld [vmem:[%s3111_s11] sm:$0xff]  ;;  %v3128_v9 = vand.u32 4294901760, %v384_v6  ;;  %v3131_v11 = vand.u32 4294901760, %v394_v8  ;;  %v388_v13 = vld [vmem:[#allocation5 + $0x20] sm:$0xff]  ;;  %v385_v37 = vld [vmem:[#allocation5 + $0x8] sm:$0xff] }
  0x39   : > { %v398_v10 = vsel %vm396_vm0, %v383_v7, 0  ;;  %v391_v12 = vld [vmem:[#allocation5 + $0x38] sm:$0xff]  ;;  %413 = vmatpush.msra.mxu0 %v3121_v3  ;;  %v442_v14 = vsub.f32 %v393_v0, %v3121_v3  ;;  %513 = vmatpush.msra.mxu3 %v3121_v3  ;;  %v448_v15 = vsub.f32 %v390_v1, %v3123_v4  ;;  %v3148_v21 = vand.u32 4294901760, %v388_v13  ;;  %v392_v57 = vld [vmem:[#allocation5 + $0x40] sm:$0xff]  ;;  %v389_v60 = vld [vmem:[#allocation5 + $0x28] sm:$0xff]  ;;  %s2952_s5 = smov 64  }
  0x3a   : > { %v454_v16 = vsub.f32 %v387_v2, %v3125_v5  ;;  %v3138_v17 = vand.u32 4294901760, %v398_v10  ;;  %v3141_v18 = vsub.f32 %v384_v6, %v3128_v9  ;;  %v3144_v19 = vsub.f32 %v394_v8, %v3131_v11  ;;  %v395_v55 = vld [vmem:[#allocation5 + $0x58] sm:$0xff]  ;;  %v386_v0 = vld [vmem:[#allocation5 + $0x10] sm:$0xff]  ;;  %s2953_s17 = smov 32   ;;  %s2674_s15 = sshll.u32 %s3029_s16, 3 }
  0x3b   : > { %v3146_v20 = vand.u32 4294901760, %v391_v12  ;;  %484 = vmatpush.msra.mxu2 %v442_v14  ;;  %415 = vmatpush.msra.mxu0 %v3123_v4  ;;  %v443_v22 = vand.u32 4294901760, %v442_v14  ;;  %v449_v23 = vand.u32 4294901760, %v448_v15  ;;  %v3161_v29 = vsub.f32 %v388_v13, %v3148_v21  ;;  %s382_s16 = scalar_lea.vmem [#allocation8], %s2668_s28  ;;  %s2556_s24 = scalar_lea.sflag [#allocation4], %s3105_s21 }
  0x3c   : > { %v3152_v24 = vsub.f32 %v398_v10, %v3138_v17  ;;  %v455_v25 = vand.u32 4294901760, %v454_v16  ;;  %515 = vmatpush.msra.mxu3 %v3123_v4  ;;  %v628_v26 = vand.u32 4294901760, %v3144_v19  ;;  %v461_v27 = vand.u32 4294901760, %v3141_v18  ;;  %s2568_s18 = sshll.u32 %s382_s16, 4  ;;  %s2893_s28 = scalar_lea.hbm %s3387_s9, 16  ;;  %s2569_s18 = int_to_ptr.vmem [resolvable:$true] %s2568_s18 }
  0x3d   : > { %v3158_v28 = vsub.f32 %v391_v12, %v3146_v20  ;;  %487 = vmatpush.msra.mxu2 %v448_v15  ;;  %417 = vmatpush.msra.mxu0 %v3125_v5  ;;  %v444_v30 = vsub.f32 %v442_v14, %v443_v22  ;;  %v450_v31 = vsub.f32 %v448_v15, %v449_v23  ;;  %v640_v36 = vand.u32 4294901760, %v3161_v29 }
  0x3e   : > { %v3165_v32 = vand.u32 4294901760, %v3152_v24  ;;  %v456_v33 = vsub.f32 %v454_v16, %v455_v25  ;;  %517 = vmatpush.msra.mxu3 %v3125_v5  ;;  %v629_v34 = vsub.f32 %v3144_v19, %v628_v26  ;;  %v462_v41 = vsub.f32 %v3141_v18, %v461_v27 }
  0x3f   : > { %v634_v35 = vand.u32 4294901760, %v3158_v28  ;;  %v445_v38 = vand.u32 4294901760, %v444_v30  ;;  %490 = vmatpush.msra.mxu2 %v454_v16  ;;  %419 = vmatpush.msra.mxu0 %v3128_v9  ;;  %v451_v39 = vand.u32 4294901760, %v450_v31  ;;  %v641_v46 = vsub.f32 %v3161_v29, %v640_v36 }
  0x40   : > { %v423_v40 = vsub.f32 %v3152_v24, %v3165_v32  ;;  %519 = vmatpush.msra.mxu3 %v3128_v9  ;;  %v630_v42 = vand.u32 4294901760, %v629_v34  ;;  %v457_v45 = vand.u32 4294901760, %v456_v33  ;;  %v603_v47 = vand.u32 4294901760, %v385_v37 }
  0x41   : > { %542 = vmatpush.msrb.mxu0 %v443_v22  ;;  %v635_v43 = vsub.f32 %v3158_v28, %v634_v35  ;;  %446 = vmatpush.msra.mxu1 %v445_v38  ;;  %v463_v49 = vand.u32 4294901760, %v462_v41  ;;  %v642_v51 = vand.u32 4294901760, %v641_v46  ;;  %v782_v56 = vand.u32 4294901760, %v395_v55 }
  0x42   : > { %493 = vmatpush.msra.mxu2 %v3141_v18  ;;  %v3178_v44 = vand.u32 4294901760, %v423_v40  ;;  %523 = vmatmul.f32.vlgmr.msra.gmra.mxu3 %v3165_v32  ;;  %v645_v50 = vsub.f32 %v385_v37, %v603_v47  ;;  %v784_v59 = vand.u32 4294901760, %v392_v57  ;;  %v786_v63 = vand.u32 4294901760, %v389_v60 }
  0x43   : > { %496 = vmatmul.f32.vlgmr.msra.gmra.mxu2 %v3152_v24  ;;  %v636_v48 = vand.u32 4294901760, %v635_v43  ;;  %452 = vmatpush.msra.mxu1 %v451_v39  ;;  %v812_v58 = vsub.f32 %v395_v55, %v782_v56 }
  0x44   : > { %425 = vmatmul.f32.vlgmr.msra.gmra.mxu0 %v3178_v44  ;;  %598 = vmatpush.msrb.mxu2 %v3131_v11  ;;  %v646_v52 = vand.u32 4294901760, %v645_v50  ;;  %v818_v62 = vsub.f32 %v392_v57, %v784_v59 }
  0x45   : > { %631 = vmatpush.msrb.mxu3 %v630_v42  ;;  %458 = vmatpush.msra.mxu1 %v457_v45  ;;  %v813_v61 = vand.u32 4294901760, %v812_v58 }
  0x46   : > { %546 = vmatpush.msrb.mxu0 %v449_v23  ;;  %600 = vmatpush.msrb.mxu2 %v3146_v20  ;;  %v647_v53 = vsub.f32 %v645_v50, %v646_v52  ;;  %v819_v2 = vand.u32 4294901760, %v818_v62 }
  0x47   : > { %637 = vmatpush.msrb.mxu3 %v636_v48  ;;  %464 = vmatpush.msra.mxu1 %v463_v49  ;;  %v814_v1 = vsub.f32 %v812_v58, %v813_v61 }
  0x48   : > { %550 = vmatpush.msrb.mxu0 %v455_v25  ;;  %466 = vmatmul.f32.vlgmr.msra.gmra.mxu1 %v3138_v17  ;;  %v648_v54 = vand.u32 4294901760, %v647_v53  ;;  %v820_v6 = vsub.f32 %v818_v62, %v819_v2 }
  0x49   : > { %602 = vmatpush.msrb.mxu2 %v3148_v21  ;;  %573 = vmatpush.msrb.mxu1 %v3121_v3  ;;  %v824_v3 = vsub.f32 %v389_v60, %v786_v63 }
  0x4a   : > { %643 = vmatpush.msrb.mxu3 %v642_v51  ;;  %554 = vmatpush.msrb.mxu0 %v461_v27 }
  0x4b   : > { %604 = vmatpush.msrb.mxu2 %v603_v47  ;;  %575 = vmatpush.msrb.mxu1 %v3123_v4  ;;  %v788_v4 = vand.u32 4294901760, %v386_v0  ;;  %v825_v7 = vand.u32 4294901760, %v824_v3 }
  0x4c   : > { %649 = vmatpush.msrb.mxu3 %v648_v54  ;;  %556 = vmatmul.f32.vlgmr.msrb.gmra.mxu0 %v3138_v17 }
  0x4d   : > { %610 = vmatmul.f32.vlgmr.msrb.gmra.mxu2 %v3178_v44  ;;  %651 = vmatmul.f32.vlgmr.msrb.gmra.mxu3 %v3138_v17  ;;  %v830_v8 = vsub.f32 %v386_v0, %v788_v4  ;;  %v826_v10 = vsub.f32 %v824_v3, %v825_v7 }
  0x4e   : > { %577 = vmatpush.msrb.mxu1 %v3125_v5  ;;  %669 = vmatpush.msra.mxu0 %v3144_v19  ;;  %v815_v5 = vand.u32 4294901760, %v814_v1 }
  0x4f   : > { %727 = vmatpush.msra.mxu2 %v628_v26  ;;  %758 = vmatpush.msra.mxu3 %v3131_v11  ;;  %v827_v12 = vand.u32 4294901760, %v826_v10 }
  0x50   : > { %579 = vmatpush.msrb.mxu1 %v3128_v9  ;;  %672 = vmatpush.msra.mxu0 %v3158_v28  ;;  %v821_v9 = vand.u32 4294901760, %v820_v6 }
  0x51   : > { %731 = vmatpush.msra.mxu2 %v634_v35  ;;  %581 = vmatmul.f32.vlgmr.msrb.gmra.mxu1 %v3138_v17 }
  0x52   : > { %760 = vmatpush.msra.mxu3 %v3146_v20  ;;  %675 = vmatpush.msra.mxu0 %v3161_v29 }
  0x53   : > { %698 = vmatpush.msra.mxu1 %v3131_v11  ;;  %735 = vmatpush.msra.mxu2 %v640_v36  ;;  %v831_v11 = vand.u32 4294901760, %v830_v8 }
  0x54   : > { %762 = vmatpush.msra.mxu3 %v3148_v21  ;;  %678 = vmatpush.msra.mxu0 %v645_v50 }
  0x55   : > { %700 = vmatpush.msra.mxu1 %v3146_v20  ;;  %739 = vmatpush.msra.mxu2 %v646_v52  ;;  %v832_v13 = vsub.f32 %v830_v8, %v831_v11 }
  0x56   : > { %681 = vmatmul.f32.vlgmr.msra.gmra.mxu0 %v3152_v24  ;;  %741 = vmatmul.f32.vlgmr.msra.gmra.mxu2 %v3138_v17 }
  0x57   : > { %702 = vmatpush.msra.mxu1 %v3148_v21  ;;  %764 = vmatpush.msra.mxu3 %v603_v47  ;;  %v833_v14 = vand.u32 4294901760, %v832_v13 }
  0x58   : > { %766 = vmatmul.f32.vlgmr.msra.gmra.mxu3 %v3138_v17  ;;  %783 = vmatpush.msrb.mxu0 %v782_v56 }
  0x59   : > { %704 = vmatpush.msra.mxu1 %v603_v47  ;;  %883 = vmatpush.msrb.mxu3 %v782_v56 }
  0x5a   : > { %708 = vmatmul.f32.vlgmr.msra.gmra.mxu1 %v3165_v32  ;;  %854 = vmatpush.msrb.mxu2 %v812_v58 }
  0x5b   : > { %785 = vmatpush.msrb.mxu0 %v784_v59  ;;  %885 = vmatpush.msrb.mxu3 %v784_v59 }
  0x5c   : > { %857 = vmatpush.msrb.mxu2 %v818_v62  ;;  %816 = vmatpush.msrb.mxu1 %v815_v5 }
  0x5d   : > { %787 = vmatpush.msrb.mxu0 %v786_v63  ;;  %887 = vmatpush.msrb.mxu3 %v786_v63 }
  0x5e   : > { %860 = vmatpush.msrb.mxu2 %v824_v3  ;;  %822 = vmatpush.msrb.mxu1 %v821_v9 }
  0x5f   : > { %789 = vmatpush.msrb.mxu0 %v788_v4  ;;  %889 = vmatpush.msrb.mxu3 %v788_v4 }
  0x60   : > { %795 = vmatmul.f32.vlgmr.msrb.gmra.mxu0 %v3178_v44  ;;  %863 = vmatpush.msrb.mxu2 %v830_v8 }
  0x61   : > { %866 = vmatmul.f32.vlgmr.msrb.gmra.mxu2 %v3152_v24  ;;  %893 = vmatmul.f32.vlgmr.msrb.gmra.mxu3 %v3165_v32 }
  0x62   : > { %912 = vmatpush.msra.mxu0 %v813_v61  ;;  %828 = vmatpush.msrb.mxu1 %v827_v12 }
  0x64   : > { %916 = vmatpush.msra.mxu0 %v819_v2  ;;  %834 = vmatpush.msrb.mxu1 %v833_v14 }
  0x65   : > { %836 = vmatmul.f32.vlgmr.msrb.gmra.mxu1 %v3138_v17 }
  0x66   : > { %920 = vmatpush.msra.mxu0 %v825_v7  ;;  %943 = vmatpush.msra.mxu1 %v782_v56 }
  0x68   : > { %924 = vmatpush.msra.mxu0 %v831_v11  ;;  %945 = vmatpush.msra.mxu1 %v784_v59 }
  0x69   : > { %926 = vmatmul.f32.vlgmr.msra.gmra.mxu0 %v3138_v17 }
  0x6a   : > { %947 = vmatpush.msra.mxu1 %v786_v63 }
  0x6c   : > { %949 = vmatpush.msra.mxu1 %v788_v4 }
  0x6d   : > { %951 = vmatmul.f32.vlgmr.msra.gmra.mxu1 %v3138_v17 }
  0xc1   : > { %v426_v15 = vpop.f32.mrf.mxu0 }
  0xc5   : > { %v467_v16 = vpop.f32.mrf.mxu1  ;;  %v524_v20 = vpop.f32.mrf.mxu3 }
  0xc6   : > { %v497_v18 = vpop.f32.mrf.mxu2  ;;  %v468_v19 = vadd.f32 %v467_v16, %v426_v15 }
  0xc8   : > { %v498_v21 = vadd.f32 %v497_v18, %v468_v19 }
  0xc9   : > { %v557_v22 = vpop.f32.mrf.mxu0 }
  0xca   : > { %v525_v23 = vadd.f32 %v524_v20, %v498_v21 }
  0xcc   : > { %v558_v24 = vadd.f32 %v557_v22, %v525_v23 }
  0xce   : > { %v582_v25 = vpop.f32.mrf.mxu1 }
  0xcf   : > { %v3215_v26 = vadd.f32 %v582_v25, %v558_v24 }
  0xd0   : > { %v611_v27 = vpop.f32.mrf.mxu2  ;;  %v652_v28 = vpop.f32.mrf.mxu3 }
  0xd1   : > { %v956_v29 = vsel %vm396_vm0, %v3215_v26, 0  ;;  %v653_v30 = vadd.f32 %v652_v28, %v611_v27 }
  0xd2   : > { %v978_v31 = vand.u32 4294901760, %v956_v29 }
  0xd3   : > { %v682_v17 = vpop.f32.mrf.mxu0 }
  0xd4   : > { %v683_v32 = vadd.f32 %v682_v17, %v653_v30  ;;  %v979_v33 = vsub.f32 %v956_v29, %v978_v31 }
  0xd6   : > { %v980_v38 = vand.u32 4294901760, %v979_v33 }
  0xd7   : > { %v709_v34 = vpop.f32.mrf.mxu1 }
  0xd8   : > { %v710_v35 = vadd.f32 %v709_v34, %v683_v32  ;;  %v981_v42 = vsub.f32 %v979_v33, %v980_v38 }
  0xd9   : > { %v742_v36 = vpop.f32.mrf.mxu2 }
  0xda   : > { %v743_v37 = vadd.f32 %v742_v36, %v710_v35  ;;  %v982_v45 = vand.u32 4294901760, %v981_v42 }
  0xdb   : > { %v767_v39 = vpop.f32.mrf.mxu3 }
  0xdc   : > { %v3219_v40 = vadd.f32 %v767_v39, %v743_v37 }
  0xdd   : > { %v796_v49 = vpop.f32.mrf.mxu0 }
  0xde   : > { %1134 = vrot.lane.b32.xlu0 %v3219_v40, %s2951_s1  ;;  %v959_v41 = vsel %vm396_vm0, %v3219_v40, 0 }
  0xdf   : > { %v976_v43 = vand.u32 4294901760, %v959_v41 }
  0xe1   : > { %977 = vmatpush.xpose.msra.mxu2 %v976_v43  ;;  %1053 = vmatpush.xpose.msrb.mxu1 %v976_v43  ;;  %v1003_v44 = vsub.f32 %v959_v41, %v976_v43 }
  0xe2   : > { %v837_v50 = vpop.f32.mrf.mxu1 }
  0xe3   : > { %1030 = vmatpush.xpose.msrb.mxu0 %v1003_v44  ;;  %v1004_v46 = vand.u32 4294901760, %v1003_v44  ;;  %v838_v51 = vadd.f32 %v837_v50, %v796_v49 }
  0xe4   : > { %983 = vmatmul.f32.vlgmr.msra.gmra.mxu2 %v982_v45  ;;  %1057 = vmatmul.f32.vlgmr.msrb.gmra.mxu1 %v980_v38  ;;  %v867_v52 = vpop.f32.mrf.mxu2  ;;  %v894_v54 = vpop.f32.mrf.mxu3 }
  0xe5   : > { %1079 = vmatpush.xpose.msrb.mxu2 %v1004_v46  ;;  %v1005_v47 = vsub.f32 %v1003_v44, %v1004_v46  ;;  %v868_v53 = vadd.f32 %v867_v52, %v838_v51 }
  0xe6   : > { %1132 = vrot.lane.b32.xlu0 %v3215_v26, %s2951_s1  ;;  %1033 = vmatmul.f32.vlgmr.msrb.gmra.mxu0 %v979_v33  ;;  %v927_v56 = vpop.f32.mrf.mxu0 }
  0xe7   : > { %v1006_v48 = vand.u32 4294901760, %v1005_v47  ;;  %v895_v55 = vadd.f32 %v894_v54, %v868_v53 }
  0xe9   : > { %1007 = vmatpush.xpose.msra.mxu3 %v1006_v48  ;;  %v928_v57 = vadd.f32 %v927_v56, %v895_v55 }
  0xea   : > { %v952_v58 = vpop.f32.mrf.mxu1 }
  0xeb   : > { %v3227_v59 = vadd.f32 %v952_v58, %v928_v57 }
  0xec   : > { %1009 = vmatmul.f32.vlgmr.msra.gmra.mxu3 %v978_v31  ;;  %1081 = vmatmul.f32.vlgmr.msrb.gmra.mxu2 %v978_v31 }
  0xed   : > { %1101 = vmatpush.xpose.msrb.mxu3 %v976_v43  ;;  %v3234_v10 = vand.u32 4294901760, %v3227_v59 }
  0xee   : > { %1311 = vrot.lane.b32.xlu0 %v3227_v59, %s2951_s1 }
  0xef   : > { %v3238_v11 = vsub.f32 %v3227_v59, %v3234_v10 }
  0xf1   : > { %v1509_v12 = vand.u32 4294901760, %v3238_v11 }
  0xf3   : > { %v1510_v13 = vsub.f32 %v3238_v11, %v1509_v12 }
  0xf4   : > { %1103 = vmatmul.f32.vlgmr.msrb.gmra.mxu3 %v978_v31 }
  0xf5   : > { %v1511_v15 = vand.u32 4294901760, %v1510_v13 }
 0x150   : > { %v1135_v60 = vpop.permute.xlu0 %1134 }
 0x151   : > { %v1138_v61 = vsel %vm396_vm0, %v1135_v60, 0 }
 0x152   : > { %v1155_v62 = vand.u32 4294901760, %v1138_v61 }
 0x154   : > { %v1182_v63 = vsub.f32 %v1138_v61, %v1155_v62  ;;  %1156 = vmatpush.xpose.msra.mxu0 %v1155_v62  ;;  %1232 = vmatpush.xpose.msra.mxu3 %v1155_v62 }
 0x156   : > { %v1183_v0 = vand.u32 4294901760, %v1182_v63  ;;  %1209 = vmatpush.xpose.msra.mxu2 %v1182_v63 }
 0x158   : > { %v1184_v1 = vsub.f32 %v1182_v63, %v1183_v0  ;;  %v1133_v2 = vpop.permute.xlu0 %1132  ;;  %1258 = vmatpush.xpose.msrb.mxu0 %v1183_v0 }
 0x159   : > { %v1136_v3 = vsel %vm396_vm0, %v1133_v2, 0 }
 0x15a   : > { %v1185_v4 = vand.u32 4294901760, %v1184_v1  ;;  %v1157_v5 = vand.u32 4294901760, %v1136_v3 }
 0x15c   : > { %v1158_v6 = vsub.f32 %v1136_v3, %v1157_v5  ;;  %1186 = vmatpush.xpose.msra.mxu1 %v1185_v4 }
 0x15e   : > { %v1159_v7 = vand.u32 4294901760, %v1158_v6  ;;  %1212 = vmatmul.f32.vlgmr.msra.gmra.mxu2 %v1158_v6 }
 0x15f   : > { %1188 = vmatmul.f32.vlgmr.msra.gmra.mxu1 %v1157_v5 }
 0x160   : > { %1280 = vmatpush.xpose.msrb.mxu1 %v1155_v62  ;;  %v1160_v8 = vsub.f32 %v1158_v6, %v1159_v7  ;;  %1236 = vmatmul.f32.vlgmr.msra.gmra.mxu3 %v1159_v7  ;;  %v1312_v14 = vpop.permute.xlu0 %1311 }
 0x161   : > { %v1332_v16 = vand.u32 4294901760, %v1312_v14  ;;  %v1058_v24 = vpop.f32.mrf.mxu1 }
 0x162   : > { %v1161_v9 = vand.u32 4294901760, %v1160_v8 }
 0x163   : > { %v1359_v18 = vsub.f32 %v1312_v14, %v1332_v16  ;;  %1333 = vmatpush.msrb.mxu2 %v1332_v16  ;;  %v1034_v25 = vpop.f32.mrf.mxu0 }
 0x164   : > { %1162 = vmatmul.f32.vlgmr.msra.gmra.mxu0 %v1161_v9  ;;  %1409 = vmatpush.msra.mxu1 %v1332_v16 }
 0x165   : > { %v1360_v19 = vand.u32 4294901760, %v1359_v18  ;;  %1386 = vmatpush.msra.mxu0 %v1359_v18 }
 0x167   : > { %1282 = vmatmul.f32.vlgmr.msrb.gmra.mxu1 %v1157_v5  ;;  %v1361_v20 = vsub.f32 %v1359_v18, %v1360_v19  ;;  %1435 = vmatpush.msra.mxu2 %v1360_v19  ;;  %v984_v22 = vpop.f32.mrf.mxu2 }
 0x168   : > { %1512 = vmatpush.msrb.mxu1 %v1511_v15 }
 0x169   : > { %v1362_v21 = vand.u32 4294901760, %v1361_v20 }
 0x16b   : > { %1363 = vmatpush.msrb.mxu3 %v1362_v21 }
 0x16c   : > { %1260 = vmatmul.f32.vlgmr.msrb.gmra.mxu0 %v1157_v5 }
 0x16d   : > { %1482 = vmatpush.msrb.mxu0 %v3234_v10  ;;  %1457 = vmatpush.msra.mxu3 %v1332_v16 }
 0x16f   : > { %v1010_v23 = vpop.f32.mrf.mxu3  ;;  %v1082_v27 = vpop.f32.mrf.mxu2 }
 0x170   : > { %v1011_v31 = vadd.f32 %v1010_v23, %v984_v22 }
 0x172   : > { %v1035_v34 = vadd.f32 %v1034_v25, %v1011_v31 }
 0x174   : > { %v1059_v38 = vadd.f32 %v1058_v24, %v1035_v34 }
 0x176   : > { %v1083_v43 = vadd.f32 %v1082_v27, %v1059_v38 }
 0x177   : > { %v1104_v28 = vpop.f32.mrf.mxu3 }
 0x178   : > { %v1105_v45 = vadd.f32 %v1104_v28, %v1083_v43 }
 0x17a   : > { %v1108_v46 = vsel %vm1107_vm1, %v1105_v45, -inf }
 0x1dc   : > { %v1189_v29 = vpop.f32.mrf.mxu1 }
 0x1e1   : > { %v1163_v30 = vpop.f32.mrf.mxu0  ;;  %v1213_v32 = vpop.f32.mrf.mxu2 }
 0x1e2   : > { %v1190_v17 = vadd.f32 %v1189_v29, %v1163_v30 }
 0x1e3   : > { %v1237_v35 = vpop.f32.mrf.mxu3 }
 0x1e4   : > { %v1214_v33 = vadd.f32 %v1213_v32, %v1190_v17  ;;  %v1283_v41 = vpop.f32.mrf.mxu1 }
 0x1e6   : > { %v1238_v36 = vadd.f32 %v1237_v35, %v1214_v33 }
 0x1e9   : > { %v1261_v37 = vpop.f32.mrf.mxu0 }
 0x1ea   : > { %v1262_v39 = vadd.f32 %v1261_v37, %v1238_v36 }
 0x1ec   : > { %v1284_v42 = vadd.f32 %v1283_v41, %v1262_v39 }
 0x1ee   : > { %v1286_v44 = vsel %vm1107_vm1, %v1284_v42, -inf }
 0x1ef   : > { %1287 = vmax.xlane.f32.xlu1 %v1286_v44 }
 0x1f7   : > { %1109 = vmax.xlane.f32.xlu1 %v1108_v46 }
 0x210   : > { %1614 = vrot.lane.b32.xlu1 %v3219_v40, %s2952_s5 }
 0x218   : > { %1790 = vrot.lane.b32.xlu1 %v3227_v59, %s2952_s5 }
 0x220   : > { %1945 = vrot.lane.b32.xlu1 %v3219_v40, %s2953_s17 }
 0x228   : > { %1943 = vrot.lane.b32.xlu1 %v3215_v26, %s2953_s17 }
 0x262   : > { %v1288_v47 = vpop.xlane.xlu1 %1287 }
 0x263   : > { %v1289_v48 = vsub.f32 %v1284_v42, %v1288_v47 }
 0x265   : > { %v1290_v49 = vmul.f32 1.442695, %v1289_v48 }
 0x267   : > { %2758 = vpow2.f32 %v1290_v49 }
 0x26a   : > { %v1110_v50 = vpop.xlane.xlu1 %1109 }
 0x26b   : > { %v1111_v51 = vsub.f32 %v1105_v45, %v1110_v50 }
 0x26d   : > { %v2759_v52 = vpop.eup %2758  ;;  %v1112_v53 = vmul.f32 1.442695, %v1111_v51 }
 0x26e   : > { %v1292_v54 = vsel %vm1107_vm1, %v2759_v52, 0.0 }
 0x26f   : > { %2760 = vpow2.f32 %v1112_v53  ;;  %1293 = vadd.xlane.f32.xlu2 %v1292_v54 }
 0x275   : > { %v2761_v55 = vpop.eup %2760 }
 0x276   : > { %v1114_v56 = vsel %vm1107_vm1, %v2761_v55, 0.0 }
 0x277   : > { %1115 = vadd.xlane.f32.xlu2 %v1114_v56 }
 0x282   : > { %v1615_v58 = vpop.permute.xlu1 %1614 }
 0x283   : > { %v1618_v63 = vsel %vm396_vm0, %v1615_v58, 0 }
 0x284   : > { %v3257_v3 = vand.u32 4294901760, %v1618_v63 }
 0x286   : > { %v3260_v9 = vsub.f32 %v1618_v63, %v3257_v3 }
 0x288   : > { %v1663_v21 = vand.u32 4294901760, %v3260_v9 }
 0x28a   : > { %v1791_v23 = vpop.permute.xlu1 %1790  ;;  %v1664_v30 = vsub.f32 %v3260_v9, %v1663_v21 }
 0x28b   : > { %v1811_v31 = vand.u32 4294901760, %v1791_v23 }
 0x28c   : > { %v1665_v36 = vand.u32 4294901760, %v1664_v30 }
 0x28d   : > { %v1838_v37 = vsub.f32 %v1791_v23, %v1811_v31 }
 0x28f   : > { %1612 = vrot.lane.b32.xlu2 %v3215_v26, %s2952_s5  ;;  %v1839_v42 = vand.u32 4294901760, %v1838_v37 }
 0x291   : > { %v1840_v47 = vsub.f32 %v1838_v37, %v1839_v42 }
 0x292   : > { %v1946_v41 = vpop.permute.xlu1 %1945 }
 0x293   : > { %v1949_v44 = vsel %vm396_vm0, %v1946_v41, 0  ;;  %v1841_v49 = vand.u32 4294901760, %v1840_v47 }
 0x294   : > { %v3274_v48 = vand.u32 4294901760, %v1949_v44 }
 0x296   : > { %v3280_v50 = vsub.f32 %v1949_v44, %v3274_v48 }
 0x2e2   : > { %v1294_v40 = vpop.xlane.xlu2 %1293 }
 0x2e3   : > { %2762 = vrcp.f32 %v1294_v40  ;;  %v1306_v0 = vand.u32 2147483648, %v1294_v40  ;;  %v1304_v2 = vand.u32 2147483647, %v1294_v40  ;;  %vm1300_vm3 = vweird.f32 %v1294_v40 }
 0x2e5   : > { %v1307_v26 = vor.u32 1.1754944e-38, %v1306_v0  ;;  %vm1305_vm5 = vcmp.eq.f32.partialorder %v1304_v2, 8.507059e+37 }
 0x2e9   : > { %v2763_v57 = vpop.eup %2762 }
 0x2ea   : > { %v1296_v60 = vmul.f32 %v2763_v57, %v1294_v40  ;;  %v1116_v61 = vpop.xlane.xlu2 %1115  ;;  %vm1301_vm2 = vweird.f32 %v2763_v57 }
 0x2eb   : > { %2764 = vrcp.f32 %v1116_v61  ;;  %vm1302_vm4 = vmor %vm1300_vm3, %vm1301_vm2  ;;  %v1128_v15 = vand.u32 2147483648, %v1116_v61  ;;  %v1126_v18 = vand.u32 2147483647, %v1116_v61  ;;  %vm1122_vm7 = vweird.f32 %v1116_v61 }
 0x2ec   : > { %v1297_v62 = vsub.f32 1.0, %v1296_v60 }
 0x2ed   : > { %v1129_v24 = vor.u32 1.1754944e-38, %v1128_v15  ;;  %vm1127_vm9 = vcmp.eq.f32.partialorder %v1126_v18, 8.507059e+37 }
 0x2ee   : > { %v1298_v1 = vmul.f32 %v2763_v57, %v1297_v62 }
 0x2f0   : > { %v1299_v4 = vadd.f32 %v2763_v57, %v1298_v1 }
 0x2f1   : > { %v2765_v5 = vpop.eup %2764 }
 0x2f2   : > { %v1303_v6 = vsel %vm1302_vm4, %v2763_v57, %v1299_v4  ;;  %v1118_v7 = vmul.f32 %v2765_v5, %v1116_v61  ;;  %vm1123_vm6 = vweird.f32 %v2765_v5  ;;  %v1613_v38 = vpop.permute.xlu2 %1612 }
 0x2f3   : > { %v1308_v8 = vsel %vm1305_vm5, %v1307_v26, %v1303_v6  ;;  %vm1124_vm8 = vmor %vm1122_vm7, %vm1123_vm6  ;;  %v1616_v43 = vsel %vm396_vm0, %v1613_v38, 0 }
 0x2f4   : > { %v1119_v13 = vsub.f32 1.0, %v1118_v7  ;;  %v1309_v14 = vmul.f32 %v2759_v52, %v1308_v8  ;;  %v1637_v45 = vand.u32 4294901760, %v1616_v43  ;;  %v1994_v52 = vand.u32 4294901760, %v3280_v50 }
 0x2f6   : > { %v1120_v16 = vmul.f32 %v2765_v5, %v1119_v13  ;;  %v1315_v19 = vsel %vm1107_vm1, %v1309_v14, 0  ;;  %v1995_v54 = vsub.f32 %v3280_v50, %v1994_v52 }
 0x2f7   : > { %v1334_v20 = vand.u32 4294901760, %v1315_v19 }
 0x2f8   : > { %v1121_v22 = vadd.f32 %v2765_v5, %v1120_v16  ;;  %v1996_v56 = vand.u32 4294901760, %v1995_v54 }
 0x2f9   : > { %1365 = vmatmul.f32.vlgmr.msrb.gmra.mxu3 %v1334_v20  ;;  %v1335_v25 = vsub.f32 %v1315_v19, %v1334_v20 }
 0x2fa   : > { %v1125_v27 = vsel %vm1124_vm8, %v2765_v5, %v1121_v22  ;;  %1558 = vmatpush.msrb.mxu3 %v3234_v10 }
 0x2fb   : > { %v1130_v28 = vsel %vm1127_vm9, %v1129_v24, %v1125_v27  ;;  %1389 = vmatmul.f32.vlgmr.msra.gmra.mxu0 %v1335_v25  ;;  %v1336_v29 = vand.u32 4294901760, %v1335_v25 }
 0x2fc   : > { %1584 = vmatpush.msra.mxu0 %v1509_v12  ;;  %v1131_v17 = vmul.f32 %v2761_v55, %v1130_v28 }
 0x2fd   : > { %1413 = vmatmul.f32.vlgmr.msra.gmra.mxu1 %v1336_v29  ;;  %v1337_v32 = vsub.f32 %v1335_v25, %v1336_v29 }
 0x2fe   : > { %1606 = vmatpush.msra.mxu1 %v3234_v10  ;;  %v1464_v33 = vsel %vm1107_vm1, %v1131_v17, 0 }
 0x2ff   : > { %v1338_v34 = vand.u32 4294901760, %v1337_v32  ;;  %v1483_v35 = vand.u32 4294901760, %v1464_v33 }
 0x301   : > { %1339 = vmatmul.f32.vlgmr.msrb.gmra.mxu2 %v1338_v34  ;;  %1459 = vmatmul.f32.vlgmr.msra.gmra.mxu3 %v1334_v20  ;;  %v1484_v39 = vsub.f32 %v1464_v33, %v1483_v35 }
 0x302   : > { %1535 = vmatpush.msrb.mxu2 %v3238_v11  ;;  %1666 = vmatpush.xpose.msra.mxu3 %v1665_v36  ;;  %v1638_v11 = vsub.f32 %v1616_v43, %v1637_v45 }
 0x303   : > { %v1485_v12 = vand.u32 4294901760, %v1484_v39 }
 0x304   : > { %v1639_v51 = vand.u32 4294901760, %v1638_v11 }
 0x305   : > { %1514 = vmatmul.f32.vlgmr.msrb.gmra.mxu1 %v1483_v35  ;;  %v1486_v10 = vsub.f32 %v1484_v39, %v1485_v12 }
 0x306   : > { %1712 = vmatpush.xpose.msrb.mxu1 %v3257_v3  ;;  %v1640_v53 = vsub.f32 %v1638_v11, %v1639_v51 }
 0x307   : > { %v1487_v46 = vand.u32 4294901760, %v1486_v10 }
 0x308   : > { %v1641_v55 = vand.u32 4294901760, %v1640_v53 }
 0x309   : > { %1437 = vmatmul.f32.vlgmr.msra.gmra.mxu2 %v1334_v20  ;;  %1488 = vmatmul.f32.vlgmr.msrb.gmra.mxu0 %v1487_v46 }
 0x30a   : > { %1562 = vmatmul.f32.vlgmr.msrb.gmra.mxu3 %v1485_v12  ;;  %1636 = vmatpush.xpose.msra.mxu2 %v3257_v3 }
 0x30b   : > { %1689 = vmatpush.xpose.msrb.mxu0 %v3260_v9  ;;  %1760 = vmatpush.xpose.msrb.mxu3 %v3257_v3 }
 0x30d   : > { %1608 = vmatmul.f32.vlgmr.msra.gmra.mxu1 %v1483_v35 }
 0x30e   : > { %1842 = vmatpush.msra.mxu1 %v1841_v49 }
 0x311   : > { %1538 = vmatmul.f32.vlgmr.msrb.gmra.mxu2 %v1484_v39  ;;  %1586 = vmatmul.f32.vlgmr.msra.gmra.mxu0 %v1483_v35  ;;  %v1944_v39 = vpop.permute.xlu1 %1943 }
 0x312   : > { %1668 = vmatmul.f32.vlgmr.msra.gmra.mxu3 %v1637_v45  ;;  %1738 = vmatpush.xpose.msrb.mxu2 %v1663_v21 }
 0x313   : > { %1812 = vmatpush.msra.mxu0 %v1811_v31  ;;  %1888 = vmatpush.msra.mxu3 %v1811_v31 }
 0x315   : > { %1716 = vmatmul.f32.vlgmr.msrb.gmra.mxu1 %v1639_v51 }
 0x316   : > { %1936 = vmatpush.msrb.mxu1 %v1811_v31 }
 0x319   : > { %1642 = vmatmul.f32.vlgmr.msra.gmra.mxu2 %v1641_v55  ;;  %1692 = vmatmul.f32.vlgmr.msrb.gmra.mxu0 %v1638_v11 }
 0x31a   : > { %1762 = vmatmul.f32.vlgmr.msrb.gmra.mxu3 %v1637_v45  ;;  %1865 = vmatpush.msra.mxu2 %v1838_v37 }
 0x31b   : > { %1914 = vmatpush.msrb.mxu0 %v1839_v42  ;;  %1997 = vmatpush.xpose.msrb.mxu3 %v1996_v56  ;;  %v1947_v42 = vsel %vm396_vm0, %v1944_v39, 0 }
 0x321   : > { %1740 = vmatmul.f32.vlgmr.msrb.gmra.mxu2 %v1637_v45  ;;  %v1968_v45 = vand.u32 4294901760, %v1947_v42 }
 0x322   : > { %1967 = vmatpush.xpose.msrb.mxu2 %v3274_v48 }
 0x323   : > { %v1969_v51 = vsub.f32 %v1947_v42, %v1968_v45 }
 0x325   : > { %v1970_v55 = vand.u32 4294901760, %v1969_v51 }
 0x378   : > { %v1390_v57 = vpop.f32.mrf.mxu0 }
 0x37a   : > { %v1414_v58 = vpop.f32.mrf.mxu1 }
 0x37c   : > { %v1366_v40 = vpop.f32.mrf.mxu3 }
 0x382   : > { %v1515_v4 = vpop.f32.mrf.mxu1 }
 0x384   : > { %v1340_v60 = vpop.f32.mrf.mxu2  ;;  %v1460_v63 = vpop.f32.mrf.mxu3 }
 0x385   : > { %v1367_v61 = vadd.f32 %v1366_v40, %v1340_v60 }
 0x386   : > { %v1489_v1 = vpop.f32.mrf.mxu0 }
 0x387   : > { %v1391_v62 = vadd.f32 %v1390_v57, %v1367_v61  ;;  %v1971_v57 = vsub.f32 %v1969_v51, %v1970_v55 }
 0x389   : > { %v1415_v0 = vadd.f32 %v1414_v58, %v1391_v62  ;;  %v1972_v61 = vand.u32 4294901760, %v1971_v57 }
 0x38a   : > { %v1609_v15 = vpop.f32.mrf.mxu1 }
 0x38c   : > { %v1438_v2 = vpop.f32.mrf.mxu2 }
 0x38d   : > { %v1439_v3 = vadd.f32 %v1438_v2, %v1415_v0  ;;  %v1563_v6 = vpop.f32.mrf.mxu3 }
 0x38e   : > { %v1587_v8 = vpop.f32.mrf.mxu0 }
 0x38f   : > { %v1461_v5 = vadd.f32 %v1460_v63, %v1439_v3 }
 0x391   : > { %v1490_v26 = vadd.f32 %v1489_v1, %v1461_v5 }
 0x392   : > { %v1717_v24 = vpop.f32.mrf.mxu1 }
 0x393   : > { %v1516_v7 = vadd.f32 %v1515_v4, %v1490_v26 }
 0x394   : > { %v1539_v9 = vpop.f32.mrf.mxu2 }
 0x395   : > { %v1540_v13 = vadd.f32 %v1539_v9, %v1516_v7  ;;  %v1669_v19 = vpop.f32.mrf.mxu3 }
 0x396   : > { %v1693_v22 = vpop.f32.mrf.mxu0 }
 0x397   : > { %v1564_v14 = vadd.f32 %v1563_v6, %v1540_v13 }
 0x399   : > { %v1588_v16 = vadd.f32 %v1587_v8, %v1564_v14 }
 0x39b   : > { %v3287_v18 = vadd.f32 %v1609_v15, %v1588_v16 }
 0x39c   : > { %v1643_v20 = vpop.f32.mrf.mxu2 }
 0x39d   : > { %v1670_v21 = vadd.f32 %v1669_v19, %v1643_v20  ;;  %v1763_v29 = vpop.f32.mrf.mxu3 }
 0x39f   : > { %v1694_v23 = vadd.f32 %v1693_v22, %v1670_v21 }
 0x3a1   : > { %v1718_v25 = vadd.f32 %v1717_v24, %v1694_v23 }
 0x3a4   : > { %v1741_v27 = vpop.f32.mrf.mxu2 }
 0x3a5   : > { %v1742_v28 = vadd.f32 %v1741_v27, %v1718_v25 }
 0x3a7   : > { %v1764_v30 = vadd.f32 %v1763_v29, %v1742_v28 }
 0x3a9   : > { %v1766_v31 = vsel %vm1107_vm1, %v1764_v30, -inf }
 0x3aa   : > { %1767 = vmax.xlane.f32.xlu0 %v1766_v31 }
 0x41d   : > { %v1768_v17 = vpop.xlane.xlu0 %1767 }
 0x41e   : > { %v1769_v32 = vsub.f32 %v1764_v30, %v1768_v17 }
 0x420   : > { %v1770_v33 = vmul.f32 1.442695, %v1769_v32 }
 0x422   : > { %2766 = vpow2.f32 %v1770_v33 }
 0x428   : > { %v2767_v34 = vpop.eup %2766 }
 0x429   : > { %v1772_v35 = vsel %vm1107_vm1, %v2767_v34, 0.0 }
 0x42a   : > { %1773 = vadd.xlane.f32.xlu2 %v1772_v35 }
 0x49d   : > { %v1774_v36 = vpop.xlane.xlu2 %1773 }
 0x49e   : > { %2768 = vrcp.f32 %v1774_v36  ;;  %v1786_v12 = vand.u32 2147483648, %v1774_v36  ;;  %v1784_v10 = vand.u32 2147483647, %v1774_v36  ;;  %vm1780_vm11 = vweird.f32 %v1774_v36 }
 0x4a0   : > { %v1787_v46 = vor.u32 1.1754944e-38, %v1786_v12  ;;  %vm1785_vm13 = vcmp.eq.f32.partialorder %v1784_v10, 8.507059e+37 }
 0x4a4   : > { %v2769_v37 = vpop.eup %2768 }
 0x4a5   : > { %v1776_v38 = vmul.f32 %v2769_v37, %v1774_v36  ;;  %vm1781_vm10 = vweird.f32 %v2769_v37 }
 0x4a6   : > { %vm1782_vm12 = vmor %vm1780_vm11, %vm1781_vm10 }
 0x4a7   : > { %v1777_v41 = vsub.f32 1.0, %v1776_v38 }
 0x4a9   : > { %v1778_v43 = vmul.f32 %v2769_v37, %v1777_v41 }
 0x4ab   : > { %v1779_v44 = vadd.f32 %v2769_v37, %v1778_v43 }
 0x4ad   : > { %v1783_v47 = vsel %vm1782_vm12, %v2769_v37, %v1779_v44 }
 0x4ae   : > { %v1788_v11 = vsel %vm1785_vm13, %v1787_v46, %v1783_v47 }
 0x4af   : > { %v1789_v49 = vmul.f32 %v2767_v34, %v1788_v11 }
 0x4b1   : > { %v1794_v53 = vsel %vm1107_vm1, %v1789_v49, 0 }
 0x4b2   : > { %v1813_v54 = vand.u32 4294901760, %v1794_v53 }
 0x4b4   : > { %1844 = vmatmul.f32.vlgmr.msra.gmra.mxu1 %v1813_v54  ;;  %v1814_v56 = vsub.f32 %v1794_v53, %v1813_v54 }
 0x4b5   : > { %2043 = vmatpush.xpose.msra.mxu1 %v3274_v48 }
 0x4b6   : > { %1868 = vmatmul.f32.vlgmr.msra.gmra.mxu2 %v1814_v56  ;;  %v1815_v40 = vand.u32 4294901760, %v1814_v56 }
 0x4b7   : > { %2069 = vmatpush.xpose.msra.mxu2 %v1994_v52 }
 0x4b8   : > { %1892 = vmatmul.f32.vlgmr.msra.gmra.mxu3 %v1815_v40  ;;  %v1816_v58 = vsub.f32 %v1814_v56, %v1815_v40 }
 0x4b9   : > { %2091 = vmatpush.xpose.msra.mxu3 %v3274_v48 }
 0x4ba   : > { %v1817_v60 = vand.u32 4294901760, %v1816_v58 }
 0x4bc   : > { %1818 = vmatmul.f32.vlgmr.msra.gmra.mxu0 %v1817_v60  ;;  %1938 = vmatmul.f32.vlgmr.msrb.gmra.mxu1 %v1813_v54 }
 0x4bd   : > { %2020 = vmatpush.xpose.msra.mxu0 %v3280_v50 }
 0x4be   : > { %1973 = vmatmul.f32.vlgmr.msrb.gmra.mxu2 %v1972_v61 }
 0x4c0   : > { %1999 = vmatmul.f32.vlgmr.msrb.gmra.mxu3 %v1968_v45 }
 0x4c4   : > { %1916 = vmatmul.f32.vlgmr.msrb.gmra.mxu0 %v1813_v54  ;;  %2047 = vmatmul.f32.vlgmr.msra.gmra.mxu1 %v1970_v55 }
 0x4c6   : > { %2071 = vmatmul.f32.vlgmr.msra.gmra.mxu2 %v1968_v45 }
 0x4c8   : > { %2093 = vmatmul.f32.vlgmr.msra.gmra.mxu3 %v1968_v45 }
 0x4cc   : > { %2023 = vmatmul.f32.vlgmr.msra.gmra.mxu0 %v1969_v51 }
 0x531   : > { %v1845_v62 = vpop.f32.mrf.mxu1 }
 0x539   : > { %v1819_v52 = vpop.f32.mrf.mxu0  ;;  %v1869_v63 = vpop.f32.mrf.mxu2 }
 0x53a   : > { %v1846_v0 = vadd.f32 %v1845_v62, %v1819_v52  ;;  %v1939_v3 = vpop.f32.mrf.mxu1  ;;  %v2752_v62 = vld [vmem:[%s3380_s2] ss:$0 sm:$0xff] }
 0x53b   : > { %v1893_v1 = vpop.f32.mrf.mxu3 }
 0x53c   : > { %v1870_v2 = vadd.f32 %v1869_v63, %v1846_v0  ;;  %v2782_v0 = vld [vmem:[%s3111_s11] sm:$0xff] }
 0x53e   : > { %v1894_v48 = vadd.f32 %v1893_v1, %v1870_v2 }
 0x541   : > { %v1917_v4 = vpop.f32.mrf.mxu0  ;;  %v1974_v26 = vpop.f32.mrf.mxu2 }
 0x542   : > { %v1918_v5 = vadd.f32 %v1917_v4, %v1894_v48  ;;  %v2048_v14 = vpop.f32.mrf.mxu1  ;;  %v2954_v48 = vmov 32.0  }
 0x543   : > { %v2000_v50 = vpop.f32.mrf.mxu3 }
 0x544   : > { %v1940_v6 = vadd.f32 %v1939_v3, %v1918_v5  ;;  %v2001_v8 = vadd.f32 %v2000_v50, %v1974_v26 }
 0x546   : > { %v3299_v7 = vadd.f32 %v1940_v6, %v3287_v18 }
 0x549   : > { %v2024_v9 = vpop.f32.mrf.mxu0  ;;  %v2072_v16 = vpop.f32.mrf.mxu2 }
 0x54a   : > { %v2025_v13 = vadd.f32 %v2024_v9, %v2001_v8 }
 0x54b   : > { %v2094_v20 = vpop.f32.mrf.mxu3 }
 0x54c   : > { %v2049_v15 = vadd.f32 %v2048_v14, %v2025_v13 }
 0x54e   : > { %v2073_v19 = vadd.f32 %v2072_v16, %v2049_v15  ;;  %v2322_v15 = vld [vmem:[#allocation7 + $0x18] sm:$0xff] }
 0x54f   : > { %v2342_v16 = vand.u32 4294901760, %v2322_v15 }
 0x550   : > { %v2095_v21 = vadd.f32 %v2094_v20, %v2073_v19  ;;  %v2321_v19 = vld [vmem:[#allocation7 + $0x10] sm:$0xff] }
 0x551   : > { %v2372_v20 = vsub.f32 %v2322_v15, %v2342_v16 }
 0x552   : > { %v2097_v22 = vsel %vm1107_vm1, %v2095_v21, -inf }
 0x553   : > { %2098 = vmax.xlane.f32.xlu1 %v2097_v22  ;;  %v2320_v22 = vld [vmem:[#allocation7 + $0x8] sm:$0xff] }
 0x5c6   : > { %v2099_v23 = vpop.xlane.xlu1 %2098 }
 0x5c7   : > { %v2100_v24 = vsub.f32 %v2095_v21, %v2099_v23  ;;  %v2344_v21 = vand.u32 4294901760, %v2321_v19  ;;  %v2373_v23 = vand.u32 4294901760, %v2372_v20 }
 0x5c9   : > { %v2101_v25 = vmul.f32 1.442695, %v2100_v24  ;;  %v2378_v24 = vsub.f32 %v2321_v19, %v2344_v21 }
 0x5cb   : > { %2770 = vpow2.f32 %v2101_v25  ;;  %v2346_v25 = vand.u32 4294901760, %v2320_v22 }
 0x5d1   : > { %v2771_v27 = vpop.eup %2770 }
 0x5d2   : > { %v2103_v18 = vsel %vm1107_vm1, %v2771_v27, 0.0 }
 0x5d3   : > { %2104 = vadd.xlane.f32.xlu0 %v2103_v18  ;;  %v2374_v18 = vsub.f32 %v2372_v20, %v2373_v23 }
 0x5e7   : > { %2121 = vrot.lane.b32.xlu0 %v3227_v59, %s2953_s17  ;;  %s2566_s17 = scalar_lea.hbm %s3387_s9, %s2674_s15 }
 0x5e8   : > { %s2570_s29 = sshll.u32 %s2566_s17, 4  ;;  %s2571_s29 = int_to_ptr.hbm [resolvable:$true] %s2570_s29 }
 0x5e9   : > { %s2887_s25 = sshra.s32 %s2571_s29, 4  ;;  %s2888_s25 = int_to_ptr.hbm [resolvable:$true] %s2887_s25 }
 0x5ea   : > { %s2889_s26 = scalar_lea.hbm %s2888_s25, 8  ;;  %p2894_p12 = scmp.lt.s32.totalorder %s2888_s25, %s3387_s9 }
 0x5eb   : > { %p2890_p1 = scmp.ne.s32.totalorder %s2888_s25, %s2889_s26  ;;  %p2895_p7 = scmp.lt.s32.totalorder %s2893_s28, %s2889_s26 }
 0x5ed   : > { %p2891_p3 = pnand %p2890_p1, %p3074_p4  ;;  %p2896_p8 = por %p2895_p7, %p2894_p12 }
 0x5ef   : > { %p2892_p5 = pneg %p2891_p3 }
 0x5f1   : > { %p2897_p9 = pnand %p2896_p8, %p2892_p5 }
 0x646   : > { %v2105_v28 = vpop.xlane.xlu0 %2104 }
 0x647   : > { %2772 = vrcp.f32 %v2105_v28  ;;  %v2117_v17 = vand.u32 2147483648, %v2105_v28  ;;  %v2115_v33 = vand.u32 2147483647, %v2105_v28  ;;  %vm2111_vm15 = vweird.f32 %v2105_v28 }
 0x648   : > { %2774 = vrcp.f32 %v2954_v48 }
 0x649   : > { %v2118_v35 = vor.u32 1.1754944e-38, %v2117_v17  ;;  %vm2116_vm3 = vcmp.eq.f32.partialorder %v2115_v33, 8.507059e+37 }
 0x64d   : > { %v2773_v29 = vpop.eup %2772 }
 0x64e   : > { %v2107_v30 = vmul.f32 %v2773_v29, %v2105_v28  ;;  %vm2112_vm14 = vweird.f32 %v2773_v29  ;;  %v2775_v3 = vpop.eup %2774  ;;  %v2379_v28 = vand.u32 4294901760, %v2378_v24 }
 0x64f   : > { %vm2113_vm2 = vmor %vm2111_vm15, %vm2112_vm14  ;;  %v2286_v4 = vmul.f32 32.0, %v2775_v3 }
 0x650   : > { %v2108_v31 = vsub.f32 1.0, %v2107_v30  ;;  %v2380_v17 = vsub.f32 %v2378_v24, %v2379_v28 }
 0x651   : > { %v2287_v5 = vsub.f32 1.0, %v2286_v4 }
 0x652   : > { %v2109_v32 = vmul.f32 %v2773_v29, %v2108_v31  ;;  %v2375_v31 = vand.u32 4294901760, %v2374_v18 }
 0x653   : > { %v2288_v26 = vmul.f32 %v2775_v3, %v2287_v5 }
 0x654   : > { %v2110_v34 = vadd.f32 %v2773_v29, %v2109_v32 }
 0x655   : > { %v2289_v6 = vadd.f32 %v2775_v3, %v2288_v26 }
 0x656   : > { %v2114_v36 = vsel %vm2113_vm2, %v2773_v29, %v2110_v34  ;;  %v2384_v29 = vsub.f32 %v2320_v22, %v2346_v25  ;;  %v2381_v34 = vand.u32 4294901760, %v2380_v17 }
 0x657   : > { %v2119_v37 = vsel %vm2116_vm3, %v2118_v35, %v2114_v36 }
 0x658   : > { %v2120_v38 = vmul.f32 %v2771_v27, %v2119_v37  ;;  %v2319_v27 = vld [vmem:[#allocation7] sm:$0xff]  ;;  %v2385_v32 = vand.u32 4294901760, %v2384_v29 }
 0x659   : > { %v2122_v39 = vpop.permute.xlu0 %2121  ;;  %v2348_v30 = vand.u32 4294901760, %v2319_v27 }
 0x65a   : > { %v2142_v41 = vand.u32 4294901760, %v2122_v39  ;;  %v2125_v59 = vsel %vm1107_vm1, %v2120_v38, 0  ;;  %vm2290_vm1 = vweird.f32 %v2775_v3  ;;  %v2386_v35 = vsub.f32 %v2384_v29, %v2385_v32 }
 0x65b   : > { %v2144_v12 = vand.u32 4294901760, %v2125_v59  ;;  %v3312_v50 = vsel %vm2290_vm1, %v2775_v3, %v2289_v6  ;;  %v2390_v33 = vsub.f32 %v2319_v27, %v2348_v30 }
 0x65c   : > { %v2169_v42 = vsub.f32 %v2122_v39, %v2142_v41  ;;  %2143 = vmatpush.msrb.mxu0 %v2142_v41  ;;  %2219 = vmatpush.msrb.mxu3 %v2142_v41  ;;  %v2387_v37 = vand.u32 4294901760, %v2386_v35 }
 0x65d   : > { %v2145_v43 = vsub.f32 %v2125_v59, %v2144_v12  ;;  %v2391_v36 = vand.u32 4294901760, %v2390_v33 }
 0x65e   : > { %v2170_v10 = vand.u32 4294901760, %v2169_v42  ;;  %2196 = vmatpush.msrb.mxu2 %v2169_v42  ;;  %2376 = vmatpush.msra.mxu3 %v2375_v31 }
 0x65f   : > { %2199 = vmatmul.f32.vlgmr.msrb.gmra.mxu2 %v2145_v43  ;;  %v2146_v44 = vand.u32 4294901760, %v2145_v43  ;;  %v2392_v38 = vsub.f32 %v2390_v33, %v2391_v36 }
 0x660   : > { %v2171_v45 = vsub.f32 %v2169_v42, %v2170_v10  ;;  %2245 = vmatpush.msra.mxu0 %v2170_v10  ;;  %2343 = vmatpush.msra.mxu2 %v2342_v16 }
 0x661   : > { %2223 = vmatmul.f32.vlgmr.msrb.gmra.mxu3 %v2146_v44  ;;  %v2147_v46 = vsub.f32 %v2145_v43, %v2146_v44  ;;  %v2393_v39 = vand.u32 4294901760, %v2392_v38 }
 0x662   : > { %v2172_v47 = vand.u32 4294901760, %v2171_v45  ;;  %2345 = vmatpush.msra.mxu2 %v2344_v21  ;;  %2382 = vmatpush.msra.mxu3 %v2381_v34  ;;  %v2757_v34 = vld [vmem:[%s3386_s8] ss:$0 sm:$0xff] }
 0x663   : > { %v2148_v11 = vand.u32 4294901760, %v2147_v46 }
 0x664   : > { %2173 = vmatpush.msrb.mxu1 %v2172_v47  ;;  %2347 = vmatpush.msra.mxu2 %v2346_v25  ;;  %v2753_v47 = vld [vmem:[%s3381_s3] ss:$0 sm:$0xff] }
 0x665   : > { %2149 = vmatmul.f32.vlgmr.msrb.gmra.mxu0 %v2148_v11  ;;  %2175 = vmatmul.f32.vlgmr.msrb.gmra.mxu1 %v2144_v12 }
 0x666   : > { %2267 = vmatpush.msra.mxu1 %v2142_v41  ;;  %2414 = vmatpush.msrb.mxu0 %v2372_v20 }
 0x667   : > { %2349 = vmatpush.msra.mxu2 %v2348_v30  ;;  %2388 = vmatpush.msra.mxu3 %v2387_v37 }
 0x668   : > { %2443 = vmatpush.msrb.mxu1 %v2342_v16  ;;  %2417 = vmatpush.msrb.mxu0 %v2378_v24 }
 0x669   : > { %2472 = vmatpush.msrb.mxu2 %v2373_v23  ;;  %2394 = vmatpush.msra.mxu3 %v2393_v39 }
 0x66a   : > { %2445 = vmatpush.msrb.mxu1 %v2344_v21  ;;  %2420 = vmatpush.msrb.mxu0 %v2384_v29 }
 0x66b   : > { %2476 = vmatpush.msrb.mxu2 %v2379_v28  ;;  %2503 = vmatpush.msrb.mxu3 %v2342_v16 }
 0x66c   : > { %2447 = vmatpush.msrb.mxu1 %v2346_v25  ;;  %2423 = vmatpush.msrb.mxu0 %v2390_v33 }
 0x66d   : > { %2247 = vmatmul.f32.vlgmr.msra.gmra.mxu0 %v2144_v12  ;;  %2269 = vmatmul.f32.vlgmr.msra.gmra.mxu1 %v2144_v12 }
 0x66e   : > { %2449 = vmatpush.msrb.mxu1 %v2348_v30  ;;  %2480 = vmatpush.msrb.mxu2 %v2385_v32  ;;  %v2756_v32 = vld [vmem:[%s3385_s7] ss:$0 sm:$0xff] }
 0x66f   : > { %2505 = vmatpush.msrb.mxu3 %v2344_v21 }
 0x670   : > { %2484 = vmatpush.msrb.mxu2 %v2391_v36 }
 0x671   : > { %2507 = vmatpush.msrb.mxu3 %v2346_v25 }
 0x673   : > { %2509 = vmatpush.msrb.mxu3 %v2348_v30 }
 0x6e2   : > { %v2150_v49 = vpop.f32.mrf.mxu0  ;;  %v2176_v51 = vpop.f32.mrf.mxu1 }
 0x6e3   : > { %v2177_v53 = vadd.f32 %v2176_v51, %v2150_v49  ;;  %v2200_v54 = vpop.f32.mrf.mxu2  ;;  %v2754_v51 = vld [vmem:[%s3382_s4] ss:$0 sm:$0xff] }
 0x6e4   : > { %v2224_v56 = vpop.f32.mrf.mxu3 }
 0x6e5   : > { %v2201_v55 = vadd.f32 %v2200_v54, %v2177_v53 }
 0x6e7   : > { %v2225_v40 = vadd.f32 %v2224_v56, %v2201_v55 }
 0x6ea   : > { %v2248_v57 = vpop.f32.mrf.mxu0  ;;  %v2270_v60 = vpop.f32.mrf.mxu1 }
 0x6eb   : > { %v2249_v58 = vadd.f32 %v2248_v57, %v2225_v40 }
 0x6ed   : > { %v2271_v61 = vadd.f32 %v2270_v60, %v2249_v58 }
 0x6ef   : > { %v2273_v52 = vadd.f32 %v2271_v61, %v3299_v7  ;;  %v2755_v61 = vld [vmem:[%s3384_s6] ss:$0 sm:$0xff] }
 0x6f1   : > { %v2278_v63 = vadd.f32 %v2752_v62, %v2273_v52 }
 0x6f3   : > { %v2279_v1 = vadd.f32 %v2782_v0, %v2278_v63 }
 0x6f5   : > { %v2282_v2 = vsel %vm396_vm0, %v2279_v1, 0.0 }
 0x6f6   : > { %2283 = vadd.xlane.f32.xlu2 %v2282_v2 }
 0x769   : > { %v2284_v8 = vpop.xlane.xlu2 %2283 }
 0x76a   : > { %v2292_v9 = vmul.f32 %v3312_v50, %v2284_v8 }
 0x76c   : > { %v3315_v7 = vsub.f32 %v2279_v1, %v2292_v9 }
 0x76e   : > { %v2294_v13 = vmul.f32 %v3315_v7, %v3315_v7 }
 0x770   : > { %v2295_v14 = vsel %vm396_vm0, %v2294_v13, 0.0 }
 0x771   : > { %2296 = vadd.xlane.f32.xlu2 %v2295_v14 }
 0x7e4   : > { %v2297_v41 = vpop.xlane.xlu2 %2296 }
 0x7e5   : > { %v2298_v59 = vmul.f32 %v2297_v41, %v3312_v50 }
 0x7e7   : > { %v2299_v12 = vadd.f32 1e-05, %v2298_v59 }
 0x7e9   : > { %2776 = vrsqrt.f32 %v2299_v12  ;;  %vm2306_vm5 = vweird.f32 %v2299_v12 }
 0x7ef   : > { %v2777_v42 = vpop.eup %2776 }
 0x7f0   : > { %v2301_v43 = vmul.f32 %v2777_v42, %v2299_v12  ;;  %vm2307_vm4 = vweird.f32 %v2777_v42 }
 0x7f1   : > { %vm2308_vm6 = vmor %vm2306_vm5, %vm2307_vm4 }
 0x7f2   : > { %v2302_v10 = vmul.f32 %v2777_v42, %v2301_v43 }
 0x7f4   : > { %v2303_v44 = vmul.f32 0.5, %v2302_v10 }
 0x7f6   : > { %v2304_v45 = vsub.f32 1.5, %v2303_v44 }
 0x7f8   : > { %v2305_v46 = vmul.f32 %v2777_v42, %v2304_v45 }
 0x7fa   : > { %v2309_v11 = vsel %vm2308_vm6, %v2777_v42, %v2305_v46 }
 0x7fb   : > { %v2310_v49 = vmul.f32 %v2309_v11, %v3315_v7 }
 0x7fd   : > { %v2314_v53 = vmul.f32 %v2753_v47, %v2310_v49 }
 0x7ff   : > { %v2318_v54 = vadd.f32 %v2754_v51, %v2314_v53 }
 0x801   : > { %v2328_v55 = vsel %vm396_vm0, %v2318_v54, 0 }
 0x802   : > { %v2350_v56 = vand.u32 4294901760, %v2328_v55 }
 0x804   : > { %2396 = vmatmul.f32.vlgmr.msra.gmra.mxu3 %v2350_v56  ;;  %v2351_v40 = vsub.f32 %v2328_v55, %v2350_v56 }
 0x806   : > { %2426 = vmatmul.f32.vlgmr.msrb.gmra.mxu0 %v2351_v40  ;;  %v2352_v57 = vand.u32 4294901760, %v2351_v40 }
 0x808   : > { %2453 = vmatmul.f32.vlgmr.msrb.gmra.mxu1 %v2352_v57  ;;  %v2353_v58 = vsub.f32 %v2351_v40, %v2352_v57 }
 0x80a   : > { %v2354_v60 = vand.u32 4294901760, %v2353_v58 }
 0x80c   : > { %2355 = vmatmul.f32.vlgmr.msra.gmra.mxu2 %v2354_v60  ;;  %2511 = vmatmul.f32.vlgmr.msrb.gmra.mxu3 %v2350_v56 }
 0x814   : > { %2486 = vmatmul.f32.vlgmr.msrb.gmra.mxu2 %v2350_v56 }
 0x883   : > { %v2427_v1 = vpop.f32.mrf.mxu0 }
 0x885   : > { %v2454_v48 = vpop.f32.mrf.mxu1 }
 0x887   : > { %v2397_v62 = vpop.f32.mrf.mxu3 }
 0x88f   : > { %v2356_v52 = vpop.f32.mrf.mxu2  ;;  %v2512_v26 = vpop.f32.mrf.mxu3 }
 0x890   : > { %v2357_v63 = vadd.f32 %v2755_v61, %v2356_v52 }
 0x892   : > { %v2398_v0 = vadd.f32 %v2397_v62, %v2357_v63 }
 0x894   : > { %v2428_v2 = vadd.f32 %v2427_v1, %v2398_v0 }
 0x896   : > { %v2455_v3 = vadd.f32 %v2454_v48, %v2428_v2 }
 0x897   : > { %v2487_v4 = vpop.f32.mrf.mxu2 }
 0x898   : > { %v2488_v5 = vadd.f32 %v2487_v4, %v2455_v3 }
 0x89a   : > { %v2513_v6 = vadd.f32 %v2512_v26, %v2488_v5 }
 0x89c   : > { %v2516_v8 = vmin.f32 %v2513_v6, 0.0  ;;  %vm2515_vm7 = vcmp.gt.f32.partialorder %v2513_v6, 0.0 }
 0x89e   : > { %v2517_v9 = vmul.f32 1.442695, %v2516_v8 }
 0x8a0   : > { %2778 = vpow2.f32 %v2517_v9 }
 0x8a6   : > { %v2779_v7 = vpop.eup %2778 }
 0x8a7   : > { %v2672_v13 = vadd.f32 -1.0, %v2779_v7 }
 0x8a9   : > { %v2520_v14 = vsel %vm2515_vm7, %v2513_v6, %v2672_v13 }
 0x8aa   : > { %v2521_v15 = vadd.f32 %v2520_v14, %v2318_v54 }
 0x8ac   : > { %v2524_v16 = vsel %vm396_vm0, %v2521_v15, 0.0 }
 0x8ad   : > { %2525 = vadd.xlane.f32.xlu0 %v2524_v16 }
 0x920   : > { %v2526_v19 = vpop.xlane.xlu0 %2525 }
 0x921   : > { %v2527_v20 = vmul.f32 %v2526_v19, %v3312_v50 }
 0x923   : > { %v2528_v21 = vsub.f32 %v2521_v15, %v2527_v20 }
 0x925   : > { %v2529_v22 = vmul.f32 %v2528_v21, %v2528_v21 }
 0x927   : > { %v2530_v23 = vsel %vm396_vm0, %v2529_v22, 0.0 }
 0x928   : > { %2531 = vadd.xlane.f32.xlu2 %v2530_v23 }
 0x99b   : > { %v2532_v24 = vpop.xlane.xlu2 %2531 }
 0x99c   : > { %v2533_v25 = vmul.f32 %v2532_v24, %v3312_v50 }
 0x99e   : > { %v2534_v27 = vadd.f32 1e-05, %v2533_v25 }
 0x9a0   : > { %2780 = vrsqrt.f32 %v2534_v27  ;;  %vm2541_vm9 = vweird.f32 %v2534_v27 }
 0x9a6   : > { %v2781_v18 = vpop.eup %2780 }
 0x9a7   : > { %v2536_v28 = vmul.f32 %v2781_v18, %v2534_v27  ;;  %vm2542_vm8 = vweird.f32 %v2781_v18 }
 0x9a8   : > { %vm2543_vm10 = vmor %vm2541_vm9, %vm2542_vm8 }
 0x9a9   : > { %v2537_v29 = vmul.f32 %v2781_v18, %v2536_v28 }
 0x9ab   : > { %v2538_v30 = vmul.f32 0.5, %v2537_v29 }
 0x9ad   : > { %v2539_v31 = vsub.f32 1.5, %v2538_v30 }
 0x9af   : > { %v2540_v17 = vmul.f32 %v2781_v18, %v2539_v31 }
 0x9b1   : > { %v2544_v50 = vsel %vm2543_vm10, %v2781_v18, %v2540_v17 }
 0x9b2   : > { %v2545_v33 = vmul.f32 %v2544_v50, %v2528_v21 }
 0x9b4   : > { %v2549_v35 = vmul.f32 %v2756_v32, %v2545_v33 }
 0x9b6   : > { %v2553_v36 = vadd.f32 %v2757_v34, %v2549_v35 }
 0x9b8   : > { %2554 = vst.msk [vmem:[%s382_s16] sm:$0xff] %vm396_vm0, %v2553_v36 }
 0x9b9   : > { %2900 = shalt.err (!%p2897_p9)
}
 0x9ba   : > { %2687 = dma.vmem_to_hbm [thread:$0]  (%p3074_p4), %s2569_s18, 128, %s2571_s29, %s2556_s24  }
 0x9bb PF: > { %s2582_s21 = sand.u32 1, %s2931_s30   ;;  %p3401_p10 = scmp.ge.s32.totalorder %s2943_s12, 2 }
 0x9bc   : > { %s2583_s1 = scalar_lea.sflag [#allocation4], %s2582_s21 }
 0x9bd   : > { %p2701_p13 = pnand %p3401_p10, %p3078_p6 }
 0x9bf   : > { %p2702_p11 = pneg %p2701_p13 }
 0x9c1   : > { %2926 = dma.done.wait (%p2702_p11), %s2583_s1, 128  }
 0x9c2   : > { %2928 = vsyncadd (%p2702_p11), %s2583_s1, 4294967168  ;;  %s3402_s5 = sld [smem:[#allocation12_spill]]  ;;  %p23_p0 = scmp.ge.s32.totalorder %s3048_s13, 4  }
 0x9c3   : > { %s3403_s11 = sld [smem:[#allocation13_spill]]  ;;  %s3404_s30 = smov %s2935_s10 }
 0x9c4   : > { %s3406_s12 = smov %s3048_s13  ;;  %25 = sbr.rel (!%p23_p0) target bundleno = 9 (0x9), region = 109 }
 0x9c8   : > { %s3405_s10 = smov %s3402_s5 }
 0x9c9   :  { %2589 = vsyncpa [#allocation3], 1 }
 0x9ca   :  { %2591 = vsyncpa [#allocation3 + $0x1], 1 }
 0x9cb   :  { %2592 = vsyncpa [#allocation6], 1 }
 0x9cc   :  { %2593 = vsyncpa [#allocation4], 1 }
 0x9cd   :  { %2595 = vsyncpa [#allocation4 + $0x1], 1 }

</bundles_post_ra>
